<compile_context>
chip_gen: v6e
topology: v6e:2x2x1
jax: 0.10.0
libtpu: 0.0.40
codegen_flags: <defaults>
</compile_context>

<pallas_src>
import jax
import jax.numpy as jnp
from jax import lax
from jax.experimental import pallas as pl
from jax.experimental.pallas import tpu as pltpu

# ---- small Qwen3-like config ----
HIDDEN = 64
NUM_HEADS = 4
NUM_KV_HEADS = 2
HEAD_DIM = 32          # head_dim independent of hidden/num_heads in Qwen3
INTERMEDIATE = 128
NUM_LAYERS = 2
VOCAB = 128
EPS = 1e-6
ROPE_THETA = 1_000_000.0
T = 8                  # sequence length (num tokens, vLLM flattened layout)

Q_SIZE = NUM_HEADS * HEAD_DIM          # 128 (lane-dense)
KV_SIZE = NUM_KV_HEADS * HEAD_DIM      # 64
GROUP = NUM_HEADS // NUM_KV_HEADS
SCALE = HEAD_DIM ** -0.5

VMEM = pl.BlockSpec(memory_space=pltpu.MemorySpace.VMEM)   # whole array in VMEM


def _rms(x, w):
    """RMSNorm in f32 (works both inside and outside Pallas kernels)."""
    var = jnp.mean(x * x, axis=-1, keepdims=True)
    return x * lax.rsqrt(var + EPS) * w


# ---------------- fused decoder-layer kernel ----------------
def _layer_kernel(h_ref, res_ref, w_in_ref, w_post_ref,
                  wq_ref, wk_ref, wv_ref, wo_ref, wgu_ref, wd_ref,
                  qnw_ref, knw_ref, segq_ref, segk_ref, rotq_ref, rotk_ref,
                  cosq_ref, sinq_ref, cosk_ref, sink_ref,
                  h_out_ref, res_out_ref):
    f32 = jnp.float32
    bf16 = jnp.bfloat16

    # fused residual-add + input RMSNorm (first layer passes residual == 0)
    r1 = h_ref[...].astype(f32) + res_ref[...].astype(f32)        # (T, H)
    n1 = _rms(r1, w_in_ref[...]).astype(bf16)

    # qkv projection: bf16 operands, f32 accumulation on the MXU
    q = jnp.dot(n1, wq_ref[...], preferred_element_type=f32)      # (T, Q_SIZE)
    k = jnp.dot(n1, wk_ref[...], preferred_element_type=f32)      # (T, KV_SIZE)
    v = jnp.dot(n1, wv_ref[...], preferred_element_type=f32)      # (T, KV_SIZE)

    # per-head RMSNorm + neox RoPE, lane-dense token-major, via MXU helpers:
    #   seg : block-diagonal (1/head_dim) matrix -> per-head mean(x^2),
    #         broadcast across the head's lanes
    #   rot : signed permutation -> per-head rotate_half(x) = [-x2, x1]
    def head_norm_rope(x, seg, rot, w, cos, sin):
        ms = jnp.dot(x * x, seg, preferred_element_type=f32)
        xn = x * lax.rsqrt(ms + EPS) * w
        xr = jnp.dot(xn, rot, preferred_element_type=f32)
        return xn * cos + xr * sin

    q = head_norm_rope(q, segq_ref[...], rotq_ref[...], qnw_ref[...],
                       cosq_ref[...], sinq_ref[...])
    k = head_norm_rope(k, segk_ref[...], rotk_ref[...], knw_ref[...],
                       cosk_ref[...], sink_ref[...])

    # causal GQA attention (T and head count tiny -> static per-head loop,
    # everything resident in VMEM; K/V head reused by its whole query group)
    t = r1.shape[0]
    row = lax.broadcasted_iota(jnp.int32, (t, t), 0)
    col = lax.broadcasted_iota(jnp.int32, (t, t), 1)
    causal = col <= row
    outs = []
    for h in range(NUM_HEADS):
        g = h // GROUP
        qh = q[:, h * HEAD_DIM:(h + 1) * HEAD_DIM]
        kh = k[:, g * HEAD_DIM:(g + 1) * HEAD_DIM]
        vh = v[:, g * HEAD_DIM:(g + 1) * HEAD_DIM]
        s = lax.dot_general(qh, kh, (((1,), (1,)), ((), ())),
                            preferred_element_type=f32) * SCALE
        s = jnp.where(causal, s, -1e30)
        p = jnp.exp(s - jnp.max(s, axis=-1, keepdims=True))
        p = p * pl.reciprocal(jnp.sum(p, axis=-1, keepdims=True), approx=True)
        outs.append(jnp.dot(p, vh, preferred_element_type=f32))
    attn = jnp.concatenate(outs, axis=-1)                          # (T, Q_SIZE)

    # o_proj
    o = jnp.dot(attn.astype(bf16), wo_ref[...], preferred_element_type=f32)

    # fused residual-add + post-attention RMSNorm
    r2 = o + r1
    res_out_ref[...] = r2.astype(res_out_ref.dtype)
    n2 = _rms(r2, w_post_ref[...]).astype(bf16)

    # SiLU-gated MLP (gate/up packed; slices are 128-lane aligned)
    gu = jnp.dot(n2, wgu_ref[...], preferred_element_type=f32)     # (T, 2*I)
    gate = gu[:, :INTERMEDIATE]
    up = gu[:, INTERMEDIATE:]
    act = (gate * jax.nn.sigmoid(gate) * up).astype(bf16)          # SiLU(gate)*up
    h_out_ref[...] = jnp.dot(act, wd_ref[...],
                             preferred_element_type=f32).astype(h_out_ref.dtype)


def qwen3_layer(h, res, layer, consts):
    segq, segk, rotq, rotk, cosq, sinq, cosk, sink = consts
    wqkv = layer["wqkv"]
    wq = wqkv[:, :Q_SIZE]
    wk = wqkv[:, Q_SIZE:Q_SIZE + KV_SIZE]
    wv = wqkv[:, Q_SIZE + KV_SIZE:]
    args = (h, res,
            layer["input_ln"].reshape(1, -1), layer["post_ln"].reshape(1, -1),
            wq, wk, wv, layer["wo"], layer["w_gate_up"], layer["w_down"],
            jnp.tile(layer["q_norm"], NUM_HEADS).reshape(1, -1),
            jnp.tile(layer["k_norm"], NUM_KV_HEADS).reshape(1, -1),
            segq, segk, rotq, rotk, cosq, sinq, cosk, sink)
    return pl.pallas_call(
        _layer_kernel,
        out_shape=(jax.ShapeDtypeStruct(h.shape, h.dtype),
                   jax.ShapeDtypeStruct(h.shape, h.dtype)),
        in_specs=[VMEM] * len(args),
        out_specs=(VMEM, VMEM),
        # hidden & residual streams update in place (no extra HBM copies)
        input_output_aliases={0: 0, 1: 1},
    )(*args)


# ---------------- final fused add + RMSNorm ----------------
def _add_rmsnorm_kernel(h_ref, res_ref, w_ref, o_ref):
    x = h_ref[...].astype(jnp.float32) + res_ref[...].astype(jnp.float32)
    o_ref[...] = _rms(x, w_ref[...]).astype(o_ref.dtype)


def final_norm(h, res, w):
    return pl.pallas_call(
        _add_rmsnorm_kernel,
        out_shape=jax.ShapeDtypeStruct(h.shape, jnp.float32),
        in_specs=[VMEM, VMEM, VMEM],
        out_specs=VMEM,
    )(h, res, w.reshape(1, -1))


# ---------------- host-side constant builders ----------------
def _seg_matrix(width, d):
    """Block-diagonal matrix s.t. (x*x) @ seg = per-head mean(x^2) per lane."""
    idx = jnp.arange(width)
    same = (idx[:, None] // d) == (idx[None, :] // d)
    return same.astype(jnp.float32) / d


def _rot_matrix(width, d):
    """Signed permutation s.t. x @ rot = per-head [-x2, x1] (neox rotate_half)."""
    half = d // 2
    i = jnp.arange(width)[:, None]   # input lane (matmul row)
    j = jnp.arange(width)[None, :]   # output lane (matmul col)
    neg = (i == j + half) & ((j % d) < half)    # out[:, j] += -x[:, j+half]
    pos = (i == j - half) & ((j % d) >= half)   # out[:, j] += +x[:, j-half]
    return pos.astype(jnp.float32) - neg.astype(jnp.float32)


def rope_consts(positions):
    inv_freq = 1.0 / (ROPE_THETA ** (
        jnp.arange(0, HEAD_DIM, 2, dtype=jnp.float32) / HEAD_DIM))
    freqs = positions.astype(jnp.float32)[:, None] * inv_freq[None, :]  # (T, D/2)
    cos, sin = jnp.cos(freqs), jnp.sin(freqs)
    cos_h = jnp.concatenate([cos, cos], axis=-1)                        # (T, D)
    sin_h = jnp.concatenate([sin, sin], axis=-1)
    return (jnp.tile(cos_h, (1, NUM_HEADS)), jnp.tile(sin_h, (1, NUM_HEADS)),
            jnp.tile(cos_h, (1, NUM_KV_HEADS)), jnp.tile(sin_h, (1, NUM_KV_HEADS)))


# ---------------- parameters ----------------
def init_params(key):
    def w_bf16(k, shape, scale=0.02):
        return (scale * jax.random.normal(k, shape, jnp.float32)).astype(jnp.bfloat16)

    def ln_w(k, shape):
        return 1.0 + 0.1 * jax.random.normal(k, shape, jnp.float32)

    keys = jax.random.split(key, 1 + NUM_LAYERS)
    params = {
        "embed": w_bf16(keys[0], (VOCAB, HIDDEN)),
        "final_ln": jnp.ones((HIDDEN,), jnp.float32),
        "layers": [],
    }
    for i in range(NUM_LAYERS):
        lk = jax.random.split(keys[1 + i], 8)
        params["layers"].append({
            "input_ln": ln_w(lk[4], (HIDDEN,)),
            "post_ln": ln_w(lk[5], (HIDDEN,)),
            "q_norm": ln_w(lk[6], (HEAD_DIM,)),
            "k_norm": ln_w(lk[7], (HEAD_DIM,)),
            "wqkv": w_bf16(lk[0], (HIDDEN, Q_SIZE + 2 * KV_SIZE)),
            "wo": w_bf16(lk[1], (Q_SIZE, HIDDEN)),
            "w_gate_up": w_bf16(lk[2], (HIDDEN, 2 * INTERMEDIATE)),
            "w_down": w_bf16(lk[3], (INTERMEDIATE, HIDDEN)),
        })
    return params


# ---------------- full model forward (Pallas path) ----------------
def qwen3_forward(params, input_ids, positions):
    h = jnp.take(params["embed"], input_ids, axis=0)   # embedding gather (JAX glue)
    res = jnp.zeros_like(h)                            # "residual is None" == zeros
    cosq, sinq, cosk, sink = rope_consts(positions)
    consts = (_seg_matrix(Q_SIZE, HEAD_DIM), _seg_matrix(KV_SIZE, HEAD_DIM),
              _rot_matrix(Q_SIZE, HEAD_DIM), _rot_matrix(KV_SIZE, HEAD_DIM),
              cosq, sinq, cosk, sink)
    for layer in params["layers"]:
        h, res = qwen3_layer(h, res, layer, consts)
    return final_norm(h, res, params["final_ln"])      # hidden_states (T, H)
    # TODO(synk): compute_logits / lm_head are not part of forward(); omitted.


# ---------------- pure-JAX reference (same math & casts) ----------------
def qwen3_forward_ref(params, input_ids, positions):
    f32, bf16 = jnp.float32, jnp.bfloat16
    h = jnp.take(params["embed"], input_ids, axis=0)
    res = jnp.zeros_like(h)
    inv_freq = 1.0 / (ROPE_THETA ** (
        jnp.arange(0, HEAD_DIM, 2, dtype=f32) / HEAD_DIM))
    freqs = positions.astype(f32)[:, None] * inv_freq[None, :]
    cos, sin = jnp.cos(freqs), jnp.sin(freqs)

    def rope(x):                                         # x: (T, n_heads, D)
        half = HEAD_DIM // 2
        x1, x2 = x[..., :half], x[..., half:]
        c, s = cos[:, None, :], sin[:, None, :]
        return jnp.concatenate([x1 * c - x2 * s, x2 * c + x1 * s], axis=-1)

    t = h.shape[0]
    causal = jnp.tril(jnp.ones((t, t), bool))
    for layer in params["layers"]:
        r1 = h.astype(f32) + res.astype(f32)
        n1 = _rms(r1, layer["input_ln"]).astype(bf16)
        qkv = jnp.dot(n1, layer["wqkv"], preferred_element_type=f32)
        q = qkv[:, :Q_SIZE].reshape(t, NUM_HEADS, HEAD_DIM)
        k = qkv[:, Q_SIZE:Q_SIZE + KV_SIZE].reshape(t, NUM_KV_HEADS, HEAD_DIM)
        v = qkv[:, Q_SIZE + KV_SIZE:].reshape(t, NUM_KV_HEADS, HEAD_DIM)
        q = rope(_rms(q, layer["q_norm"]))
        k = rope(_rms(k, layer["k_norm"]))
        kr = jnp.repeat(k, GROUP, axis=1)
        vr = jnp.repeat(v, GROUP, axis=1)
        s = jnp.einsum("qhd,khd->hqk", q, kr) * SCALE
        s = jnp.where(causal[None], s, -1e30)
        p = jax.nn.softmax(s, axis=-1)
        attn = jnp.einsum("hqk,khd->qhd", p, vr).reshape(t, Q_SIZE)
        o = jnp.dot(attn.astype(bf16), layer["wo"], preferred_element_type=f32)
        r2 = o + r1
        n2 = _rms(r2, layer["post_ln"]).astype(bf16)
        gu = jnp.dot(n2, layer["w_gate_up"], preferred_element_type=f32)
        gate, up = gu[:, :INTERMEDIATE], gu[:, INTERMEDIATE:]
        act = (gate * jax.nn.sigmoid(gate) * up).astype(bf16)
        h = jnp.dot(act, layer["w_down"], preferred_element_type=f32).astype(bf16)
        res = r2.astype(bf16)
    return _rms(h.astype(f32) + res.astype(f32), params["final_ln"])


if __name__ == "__main__":
    key = jax.random.PRNGKey(0)
    params = init_params(key)
    input_ids = jax.random.randint(jax.random.PRNGKey(1), (T,), 0, VOCAB,
                                   dtype=jnp.int32)
    positions = jnp.arange(T, dtype=jnp.int32)

    out = jax.jit(qwen3_forward)(params, input_ids, positions)
    jax.block_until_ready(out)

    ref = jax.jit(qwen3_forward_ref)(params, input_ids, positions)
    err = float(jnp.max(jnp.abs(out.astype(jnp.float32) - ref.astype(jnp.float32))))

    assert out.shape == (T, HIDDEN) and out.dtype == jnp.float32
    assert bool(jnp.all(jnp.isfinite(out)))
    assert err < 0.1, f"mismatch vs pure-JAX reference: max abs err = {err}"
    print("KERNEL_OK")
</pallas_src>

<mosaic_0001>
module attributes {stable_mosaic.version = 11 : i64} {
  func.func @_add_rmsnorm_kernel(%arg0: memref<8x64xbf16, #tpu.memory_space<vmem>>, %arg1: memref<8x64xbf16, #tpu.memory_space<vmem>>, %arg2: memref<1x64xf32, #tpu.memory_space<vmem>>, %arg3: memref<8x64xf32, #tpu.memory_space<vmem>>) attributes {dimension_semantics = [], scalar_prefetch = 0 : i64, scratch_operands = 0 : i64, tpu.core_type = #tpu.core_type<tc>} {
    %c0 = arith.constant 0 : index
    %c0_0 = arith.constant 0 : index
    %0 = vector.load %arg0[%c0, %c0_0] : memref<8x64xbf16, #tpu.memory_space<vmem>>, vector<8x64xbf16>
    %1 = arith.extf %0 : vector<8x64xbf16> to vector<8x64xf32>
    %c0_1 = arith.constant 0 : index
    %c0_2 = arith.constant 0 : index
    %2 = vector.load %arg1[%c0_1, %c0_2] : memref<8x64xbf16, #tpu.memory_space<vmem>>, vector<8x64xbf16>
    %3 = arith.extf %2 : vector<8x64xbf16> to vector<8x64xf32>
    %4 = arith.addf %1, %3 : vector<8x64xf32>
    %c0_3 = arith.constant 0 : index
    %c0_4 = arith.constant 0 : index
    %5 = vector.load %arg2[%c0_3, %c0_4] : memref<1x64xf32, #tpu.memory_space<vmem>>, vector<1x64xf32>
    %6 = arith.mulf %4, %4 : vector<8x64xf32>
    %cst = arith.constant dense<0.000000e+00> : vector<8xf32>
    %7 = vector.multi_reduction <add>, %6, %cst [1] : vector<8x64xf32> to vector<8xf32>
    %8 = vector.shape_cast %7 : vector<8xf32> to vector<8x1xf32>
    %cst_5 = arith.constant 6.400000e+01 : f32
    %9 = vector.broadcast %cst_5 : f32 to vector<8x1xf32>
    %10 = arith.divf %8, %9 : vector<8x1xf32>
    %cst_6 = arith.constant 9.99999997E-7 : f32
    %11 = vector.broadcast %cst_6 : f32 to vector<8x1xf32>
    %12 = arith.addf %10, %11 : vector<8x1xf32>
    %13 = math.rsqrt %12 : vector<8x1xf32>
    %14 = vector.broadcast %13 : vector<8x1xf32> to vector<8x64xf32>
    %15 = arith.mulf %4, %14 : vector<8x64xf32>
    %16 = vector.broadcast %5 : vector<1x64xf32> to vector<8x64xf32>
    %17 = arith.mulf %15, %16 : vector<8x64xf32>
    %c0_7 = arith.constant 0 : index
    %c0_8 = arith.constant 0 : index
    %18 = vector.load %arg3[%c0_7, %c0_8] : memref<8x64xf32, #tpu.memory_space<vmem>>, vector<8x64xf32>
    tpu.vector_store %arg3[%c0_7, %c0_8], %17 {strides = array<i32>} : memref<8x64xf32, #tpu.memory_space<vmem>>, vector<8x64xf32>,
    return
  }
}

module attributes {stable_mosaic.version = 11 : i64} {
  func.func @_layer_kernel(%arg0: memref<8x64xbf16, #tpu.memory_space<vmem>>, %arg1: memref<8x64xbf16, #tpu.memory_space<vmem>>, %arg2: memref<1x64xf32, #tpu.memory_space<vmem>>, %arg3: memref<1x64xf32, #tpu.memory_space<vmem>>, %arg4: memref<64x128xbf16, #tpu.memory_space<vmem>>, %arg5: memref<64x64xbf16, #tpu.memory_space<vmem>>, %arg6: memref<64x64xbf16, #tpu.memory_space<vmem>>, %arg7: memref<128x64xbf16, #tpu.memory_space<vmem>>, %arg8: memref<64x256xbf16, #tpu.memory_space<vmem>>, %arg9: memref<128x64xbf16, #tpu.memory_space<vmem>>, %arg10: memref<1x128xf32, #tpu.memory_space<vmem>>, %arg11: memref<1x64xf32, #tpu.memory_space<vmem>>, %arg12: memref<128x128xf32, #tpu.memory_space<vmem>>, %arg13: memref<64x64xf32, #tpu.memory_space<vmem>>, %arg14: memref<128x128xf32, #tpu.memory_space<vmem>>, %arg15: memref<64x64xf32, #tpu.memory_space<vmem>>, %arg16: memref<8x128xf32, #tpu.memory_space<vmem>>, %arg17: memref<8x128xf32, #tpu.memory_space<vmem>>, %arg18: memref<8x64xf32, #tpu.memory_space<vmem>>, %arg19: memref<8x64xf32, #tpu.memory_space<vmem>>, %arg20: memref<8x64xbf16, #tpu.memory_space<vmem>>, %arg21: memref<8x64xbf16, #tpu.memory_space<vmem>>) attributes {dimension_semantics = [], scalar_prefetch = 0 : i64, scratch_operands = 0 : i64, tpu.core_type = #tpu.core_type<tc>} {
    %c0 = arith.constant 0 : index
    %c0_0 = arith.constant 0 : index
    %0 = vector.load %arg0[%c0, %c0_0] : memref<8x64xbf16, #tpu.memory_space<vmem>>, vector<8x64xbf16>
    %1 = arith.extf %0 : vector<8x64xbf16> to vector<8x64xf32>
    %c0_1 = arith.constant 0 : index
    %c0_2 = arith.constant 0 : index
    %2 = vector.load %arg1[%c0_1, %c0_2] : memref<8x64xbf16, #tpu.memory_space<vmem>>, vector<8x64xbf16>
    %3 = arith.extf %2 : vector<8x64xbf16> to vector<8x64xf32>
    %4 = arith.addf %1, %3 : vector<8x64xf32>
    %c0_3 = arith.constant 0 : index
    %c0_4 = arith.constant 0 : index
    %5 = vector.load %arg2[%c0_3, %c0_4] : memref<1x64xf32, #tpu.memory_space<vmem>>, vector<1x64xf32>
    %6 = arith.mulf %4, %4 : vector<8x64xf32>
    %cst = arith.constant dense<0.000000e+00> : vector<8xf32>
    %7 = vector.multi_reduction <add>, %6, %cst [1] : vector<8x64xf32> to vector<8xf32>
    %8 = vector.shape_cast %7 : vector<8xf32> to vector<8x1xf32>
    %cst_5 = arith.constant 6.400000e+01 : f32
    %9 = vector.broadcast %cst_5 : f32 to vector<8x1xf32>
    %10 = arith.divf %8, %9 : vector<8x1xf32>
    %cst_6 = arith.constant 9.99999997E-7 : f32
    %11 = vector.broadcast %cst_6 : f32 to vector<8x1xf32>
    %12 = arith.addf %10, %11 : vector<8x1xf32>
    %13 = math.rsqrt %12 : vector<8x1xf32>
    %14 = vector.broadcast %13 : vector<8x1xf32> to vector<8x64xf32>
    %15 = arith.mulf %4, %14 : vector<8x64xf32>
    %16 = vector.broadcast %5 : vector<1x64xf32> to vector<8x64xf32>
    %17 = arith.mulf %15, %16 : vector<8x64xf32>
    %18 = arith.truncf %17 : vector<8x64xf32> to vector<8x64xbf16>
    %c0_7 = arith.constant 0 : index
    %c0_8 = arith.constant 0 : index
    %19 = vector.load %arg4[%c0_7, %c0_8] : memref<64x128xbf16, #tpu.memory_space<vmem>>, vector<64x128xbf16>
    %cst_9 = arith.constant dense<0.000000e+00> : vector<8x128xf32>
    %20 = tpu.matmul %18, %19, %cst_9 {dimension_numbers = #tpu.dot_dimension_numbers<[1], [0], [0], [1], [0, 0, 1, 1], [], []>} : vector<8x64xbf16>, vector<64x128xbf16>, vector<8x128xf32> -> vector<8x128xf32>
    %c0_10 = arith.constant 0 : index
    %c0_11 = arith.constant 0 : index
    %21 = vector.load %arg5[%c0_10, %c0_11] : memref<64x64xbf16, #tpu.memory_space<vmem>>, vector<64x64xbf16>
    %cst_12 = arith.constant dense<0.000000e+00> : vector<8x64xf32>
    %22 = tpu.matmul %18, %21, %cst_12 {dimension_numbers = #tpu.dot_dimension_numbers<[1], [0], [0], [1], [0, 0, 1, 1], [], []>} : vector<8x64xbf16>, vector<64x64xbf16>, vector<8x64xf32> -> vector<8x64xf32>
    %c0_13 = arith.constant 0 : index
    %c0_14 = arith.constant 0 : index
    %23 = vector.load %arg6[%c0_13, %c0_14] : memref<64x64xbf16, #tpu.memory_space<vmem>>, vector<64x64xbf16>
    %cst_15 = arith.constant dense<0.000000e+00> : vector<8x64xf32>
    %24 = tpu.matmul %18, %23, %cst_15 {dimension_numbers = #tpu.dot_dimension_numbers<[1], [0], [0], [1], [0, 0, 1, 1], [], []>} : vector<8x64xbf16>, vector<64x64xbf16>, vector<8x64xf32> -> vector<8x64xf32>
    %c0_16 = arith.constant 0 : index
    %c0_17 = arith.constant 0 : index
    %25 = vector.load %arg12[%c0_16, %c0_17] : memref<128x128xf32, #tpu.memory_space<vmem>>, vector<128x128xf32>
    %c0_18 = arith.constant 0 : index
    %c0_19 = arith.constant 0 : index
    %26 = vector.load %arg14[%c0_18, %c0_19] : memref<128x128xf32, #tpu.memory_space<vmem>>, vector<128x128xf32>
    %c0_20 = arith.constant 0 : index
    %c0_21 = arith.constant 0 : index
    %27 = vector.load %arg10[%c0_20, %c0_21] : memref<1x128xf32, #tpu.memory_space<vmem>>, vector<1x128xf32>
    %c0_22 = arith.constant 0 : index
    %c0_23 = arith.constant 0 : index
    %28 = vector.load %arg16[%c0_22, %c0_23] : memref<8x128xf32, #tpu.memory_space<vmem>>, vector<8x128xf32>
    %c0_24 = arith.constant 0 : index
    %c0_25 = arith.constant 0 : index
    %29 = vector.load %arg17[%c0_24, %c0_25] : memref<8x128xf32, #tpu.memory_space<vmem>>, vector<8x128xf32>
    %30 = arith.mulf %20, %20 : vector<8x128xf32>
    %cst_26 = arith.constant dense<0.000000e+00> : vector<8x128xf32>
    %31 = tpu.matmul %30, %25, %cst_26 {dimension_numbers = #tpu.dot_dimension_numbers<[1], [0], [0], [1], [0, 0, 1, 1], [], []>} : vector<8x128xf32>, vector<128x128xf32>, vector<8x128xf32> -> vector<8x128xf32>
    %cst_27 = arith.constant 9.99999997E-7 : f32
    %32 = vector.broadcast %cst_27 : f32 to vector<8x128xf32>
    %33 = arith.addf %31, %32 : vector<8x128xf32>
    %34 = math.rsqrt %33 : vector<8x128xf32>
    %35 = arith.mulf %20, %34 : vector<8x128xf32>
    %36 = vector.broadcast %27 : vector<1x128xf32> to vector<8x128xf32>
    %37 = arith.mulf %35, %36 : vector<8x128xf32>
    %cst_28 = arith.constant dense<0.000000e+00> : vector<8x128xf32>
    %38 = tpu.matmul %37, %26, %cst_28 {dimension_numbers = #tpu.dot_dimension_numbers<[1], [0], [0], [1], [0, 0, 1, 1], [], []>} : vector<8x128xf32>, vector<128x128xf32>, vector<8x128xf32> -> vector<8x128xf32>
    %39 = arith.mulf %37, %28 : vector<8x128xf32>
    %40 = arith.mulf %38, %29 : vector<8x128xf32>
    %41 = arith.addf %39, %40 : vector<8x128xf32>
    %c0_29 = arith.constant 0 : index
    %c0_30 = arith.constant 0 : index
    %42 = vector.load %arg13[%c0_29, %c0_30] : memref<64x64xf32, #tpu.memory_space<vmem>>, vector<64x64xf32>
    %c0_31 = arith.constant 0 : index
    %c0_32 = arith.constant 0 : index
    %43 = vector.load %arg15[%c0_31, %c0_32] : memref<64x64xf32, #tpu.memory_space<vmem>>, vector<64x64xf32>
    %c0_33 = arith.constant 0 : index
    %c0_34 = arith.constant 0 : index
    %44 = vector.load %arg11[%c0_33, %c0_34] : memref<1x64xf32, #tpu.memory_space<vmem>>, vector<1x64xf32>
    %c0_35 = arith.constant 0 : index
    %c0_36 = arith.constant 0 : index
    %45 = vector.load %arg18[%c0_35, %c0_36] : memref<8x64xf32, #tpu.memory_space<vmem>>, vector<8x64xf32>
    %c0_37 = arith.constant 0 : index
    %c0_38 = arith.constant 0 : index
    %46 = vector.load %arg19[%c0_37, %c0_38] : memref<8x64xf32, #tpu.memory_space<vmem>>, vector<8x64xf32>
    %47 = arith.mulf %22, %22 : vector<8x64xf32>
    %cst_39 = arith.constant dense<0.000000e+00> : vector<8x64xf32>
    %48 = tpu.matmul %47, %42, %cst_39 {dimension_numbers = #tpu.dot_dimension_numbers<[1], [0], [0], [1], [0, 0, 1, 1], [], []>} : vector<8x64xf32>, vector<64x64xf32>, vector<8x64xf32> -> vector<8x64xf32>
    %cst_40 = arith.constant 9.99999997E-7 : f32
    %49 = vector.broadcast %cst_40 : f32 to vector<8x64xf32>
    %50 = arith.addf %48, %49 : vector<8x64xf32>
    %51 = math.rsqrt %50 : vector<8x64xf32>
    %52 = arith.mulf %22, %51 : vector<8x64xf32>
    %53 = vector.broadcast %44 : vector<1x64xf32> to vector<8x64xf32>
    %54 = arith.mulf %52, %53 : vector<8x64xf32>
    %cst_41 = arith.constant dense<0.000000e+00> : vector<8x64xf32>
    %55 = tpu.matmul %54, %43, %cst_41 {dimension_numbers = #tpu.dot_dimension_numbers<[1], [0], [0], [1], [0, 0, 1, 1], [], []>} : vector<8x64xf32>, vector<64x64xf32>, vector<8x64xf32> -> vector<8x64xf32>
    %56 = arith.mulf %54, %45 : vector<8x64xf32>
    %57 = arith.mulf %55, %46 : vector<8x64xf32>
    %58 = arith.addf %56, %57 : vector<8x64xf32>
    %59 = tpu.iota {dimensions = array<i32: 0>} : vector<8x8xi32>
    %60 = tpu.iota {dimensions = array<i32: 1>} : vector<8x8xi32>
    %61 = arith.cmpi sle, %60, %59 : vector<8x8xi32>
    %62 = vector.extract_strided_slice %41 {offsets = [0, 0], sizes = [8, 32], strides = [1, 1]} : vector<8x128xf32> to vector<8x32xf32>
    %63 = vector.extract_strided_slice %58 {offsets = [0, 0], sizes = [8, 32], strides = [1, 1]} : vector<8x64xf32> to vector<8x32xf32>
    %64 = vector.extract_strided_slice %24 {offsets = [0, 0], sizes = [8, 32], strides = [1, 1]} : vector<8x64xf32> to vector<8x32xf32>
    %cst_42 = arith.constant dense<0.000000e+00> : vector<8x8xf32>
    %65 = tpu.matmul %62, %63, %cst_42 {dimension_numbers = #tpu.dot_dimension_numbers<[1], [1], [0], [0], [0, 0, 1, 0], [], []>} : vector<8x32xf32>, vector<8x32xf32>, vector<8x8xf32> -> vector<8x8xf32>
    %cst_43 = arith.constant 0.176776692 : f32
    %66 = vector.broadcast %cst_43 : f32 to vector<8x8xf32>
    %67 = arith.mulf %65, %66 : vector<8x8xf32>
    %cst_44 = arith.constant -1.000000e+30 : f32
    %68 = vector.broadcast %cst_44 : f32 to vector<8x8xf32>
    %69 = arith.select %61, %67, %68 : vector<8x8xi1>, vector<8x8xf32>
    %cst_45 = arith.constant dense<0xFF800000> : vector<8xf32>
    %70 = vector.multi_reduction <maximumf>, %69, %cst_45 [1] : vector<8x8xf32> to vector<8xf32>
    %71 = vector.shape_cast %70 : vector<8xf32> to vector<8x1xf32>
    %72 = vector.broadcast %71 : vector<8x1xf32> to vector<8x8xf32>
    %73 = arith.subf %69, %72 : vector<8x8xf32>
    %74 = math.exp %73 : vector<8x8xf32>
    %cst_46 = arith.constant dense<0.000000e+00> : vector<8xf32>
    %75 = vector.multi_reduction <add>, %74, %cst_46 [1] : vector<8x8xf32> to vector<8xf32>
    %76 = vector.shape_cast %75 : vector<8xf32> to vector<8x1xf32>
    %77 = tpu.reciprocal %76 {approx = true} : vector<8x1xf32> -> vector<8x1xf32>
    %78 = vector.broadcast %77 : vector<8x1xf32> to vector<8x8xf32>
    %79 = arith.mulf %74, %78 : vector<8x8xf32>
    %cst_47 = arith.constant dense<0.000000e+00> : vector<8x32xf32>
    %80 = tpu.matmul %79, %64, %cst_47 {dimension_numbers = #tpu.dot_dimension_numbers<[1], [0], [0], [1], [0, 0, 1, 1], [], []>} : vector<8x8xf32>, vector<8x32xf32>, vector<8x32xf32> -> vector<8x32xf32>
    %81 = vector.extract_strided_slice %41 {offsets = [0, 32], sizes = [8, 32], strides = [1, 1]} : vector<8x128xf32> to vector<8x32xf32>
    %82 = vector.extract_strided_slice %58 {offsets = [0, 0], sizes = [8, 32], strides = [1, 1]} : vector<8x64xf32> to vector<8x32xf32>
    %83 = vector.extract_strided_slice %24 {offsets = [0, 0], sizes = [8, 32], strides = [1, 1]} : vector<8x64xf32> to vector<8x32xf32>
    %cst_48 = arith.constant dense<0.000000e+00> : vector<8x8xf32>
    %84 = tpu.matmul %81, %82, %cst_48 {dimension_numbers = #tpu.dot_dimension_numbers<[1], [1], [0], [0], [0, 0, 1, 0], [], []>} : vector<8x32xf32>, vector<8x32xf32>, vector<8x8xf32> -> vector<8x8xf32>
    %cst_49 = arith.constant 0.176776692 : f32
    %85 = vector.broadcast %cst_49 : f32 to vector<8x8xf32>
    %86 = arith.mulf %84, %85 : vector<8x8xf32>
    %cst_50 = arith.constant -1.000000e+30 : f32
    %87 = vector.broadcast %cst_50 : f32 to vector<8x8xf32>
    %88 = arith.select %61, %86, %87 : vector<8x8xi1>, vector<8x8xf32>
    %cst_51 = arith.constant dense<0xFF800000> : vector<8xf32>
    %89 = vector.multi_reduction <maximumf>, %88, %cst_51 [1] : vector<8x8xf32> to vector<8xf32>
    %90 = vector.shape_cast %89 : vector<8xf32> to vector<8x1xf32>
    %91 = vector.broadcast %90 : vector<8x1xf32> to vector<8x8xf32>
    %92 = arith.subf %88, %91 : vector<8x8xf32>
    %93 = math.exp %92 : vector<8x8xf32>
    %cst_52 = arith.constant dense<0.000000e+00> : vector<8xf32>
    %94 = vector.multi_reduction <add>, %93, %cst_52 [1] : vector<8x8xf32> to vector<8xf32>
    %95 = vector.shape_cast %94 : vector<8xf32> to vector<8x1xf32>
    %96 = tpu.reciprocal %95 {approx = true} : vector<8x1xf32> -> vector<8x1xf32>
    %97 = vector.broadcast %96 : vector<8x1xf32> to vector<8x8xf32>
    %98 = arith.mulf %93, %97 : vector<8x8xf32>
    %cst_53 = arith.constant dense<0.000000e+00> : vector<8x32xf32>
    %99 = tpu.matmul %98, %83, %cst_53 {dimension_numbers = #tpu.dot_dimension_numbers<[1], [0], [0], [1], [0, 0, 1, 1], [], []>} : vector<8x8xf32>, vector<8x32xf32>, vector<8x32xf32> -> vector<8x32xf32>
    %100 = vector.extract_strided_slice %41 {offsets = [0, 64], sizes = [8, 32], strides = [1, 1]} : vector<8x128xf32> to vector<8x32xf32>
    %101 = vector.extract_strided_slice %58 {offsets = [0, 32], sizes = [8, 32], strides = [1, 1]} : vector<8x64xf32> to vector<8x32xf32>
    %102 = vector.extract_strided_slice %24 {offsets = [0, 32], sizes = [8, 32], strides = [1, 1]} : vector<8x64xf32> to vector<8x32xf32>
    %cst_54 = arith.constant dense<0.000000e+00> : vector<8x8xf32>
    %103 = tpu.matmul %100, %101, %cst_54 {dimension_numbers = #tpu.dot_dimension_numbers<[1], [1], [0], [0], [0, 0, 1, 0], [], []>} : vector<8x32xf32>, vector<8x32xf32>, vector<8x8xf32> -> vector<8x8xf32>
    %cst_55 = arith.constant 0.176776692 : f32
    %104 = vector.broadcast %cst_55 : f32 to vector<8x8xf32>
    %105 = arith.mulf %103, %104 : vector<8x8xf32>
    %cst_56 = arith.constant -1.000000e+30 : f32
    %106 = vector.broadcast %cst_56 : f32 to vector<8x8xf32>
    %107 = arith.select %61, %105, %106 : vector<8x8xi1>, vector<8x8xf32>
    %cst_57 = arith.constant dense<0xFF800000> : vector<8xf32>
    %108 = vector.multi_reduction <maximumf>, %107, %cst_57 [1] : vector<8x8xf32> to vector<8xf32>
    %109 = vector.shape_cast %108 : vector<8xf32> to vector<8x1xf32>
    %110 = vector.broadcast %109 : vector<8x1xf32> to vector<8x8xf32>
    %111 = arith.subf %107, %110 : vector<8x8xf32>
    %112 = math.exp %111 : vector<8x8xf32>
    %cst_58 = arith.constant dense<0.000000e+00> : vector<8xf32>
    %113 = vector.multi_reduction <add>, %112, %cst_58 [1] : vector<8x8xf32> to vector<8xf32>
    %114 = vector.shape_cast %113 : vector<8xf32> to vector<8x1xf32>
    %115 = tpu.reciprocal %114 {approx = true} : vector<8x1xf32> -> vector<8x1xf32>
    %116 = vector.broadcast %115 : vector<8x1xf32> to vector<8x8xf32>
    %117 = arith.mulf %112, %116 : vector<8x8xf32>
    %cst_59 = arith.constant dense<0.000000e+00> : vector<8x32xf32>
    %118 = tpu.matmul %117, %102, %cst_59 {dimension_numbers = #tpu.dot_dimension_numbers<[1], [0], [0], [1], [0, 0, 1, 1], [], []>} : vector<8x8xf32>, vector<8x32xf32>, vector<8x32xf32> -> vector<8x32xf32>
    %119 = vector.extract_strided_slice %41 {offsets = [0, 96], sizes = [8, 32], strides = [1, 1]} : vector<8x128xf32> to vector<8x32xf32>
    %120 = vector.extract_strided_slice %58 {offsets = [0, 32], sizes = [8, 32], strides = [1, 1]} : vector<8x64xf32> to vector<8x32xf32>
    %121 = vector.extract_strided_slice %24 {offsets = [0, 32], sizes = [8, 32], strides = [1, 1]} : vector<8x64xf32> to vector<8x32xf32>
    %cst_60 = arith.constant dense<0.000000e+00> : vector<8x8xf32>
    %122 = tpu.matmul %119, %120, %cst_60 {dimension_numbers = #tpu.dot_dimension_numbers<[1], [1], [0], [0], [0, 0, 1, 0], [], []>} : vector<8x32xf32>, vector<8x32xf32>, vector<8x8xf32> -> vector<8x8xf32>
    %cst_61 = arith.constant 0.176776692 : f32
    %123 = vector.broadcast %cst_61 : f32 to vector<8x8xf32>
    %124 = arith.mulf %122, %123 : vector<8x8xf32>
    %cst_62 = arith.constant -1.000000e+30 : f32
    %125 = vector.broadcast %cst_62 : f32 to vector<8x8xf32>
    %126 = arith.select %61, %124, %125 : vector<8x8xi1>, vector<8x8xf32>
    %cst_63 = arith.constant dense<0xFF800000> : vector<8xf32>
    %127 = vector.multi_reduction <maximumf>, %126, %cst_63 [1] : vector<8x8xf32> to vector<8xf32>
    %128 = vector.shape_cast %127 : vector<8xf32> to vector<8x1xf32>
    %129 = vector.broadcast %128 : vector<8x1xf32> to vector<8x8xf32>
    %130 = arith.subf %126, %129 : vector<8x8xf32>
    %131 = math.exp %130 : vector<8x8xf32>
    %cst_64 = arith.constant dense<0.000000e+00> : vector<8xf32>
    %132 = vector.multi_reduction <add>, %131, %cst_64 [1] : vector<8x8xf32> to vector<8xf32>
    %133 = vector.shape_cast %132 : vector<8xf32> to vector<8x1xf32>
    %134 = tpu.reciprocal %133 {approx = true} : vector<8x1xf32> -> vector<8x1xf32>
    %135 = vector.broadcast %134 : vector<8x1xf32> to vector<8x8xf32>
    %136 = arith.mulf %131, %135 : vector<8x8xf32>
    %cst_65 = arith.constant dense<0.000000e+00> : vector<8x32xf32>
    %137 = tpu.matmul %136, %121, %cst_65 {dimension_numbers = #tpu.dot_dimension_numbers<[1], [0], [0], [1], [0, 0, 1, 1], [], []>} : vector<8x8xf32>, vector<8x32xf32>, vector<8x32xf32> -> vector<8x32xf32>
    %138 = tpu.concatenate %80, %99, %118, %137 in 1 : vector<8x32xf32>, vector<8x32xf32>, vector<8x32xf32>, vector<8x32xf32> -> vector<8x128xf32>
    %139 = arith.truncf %138 : vector<8x128xf32> to vector<8x128xbf16>
    %c0_66 = arith.constant 0 : index
    %c0_67 = arith.constant 0 : index
    %140 = vector.load %arg7[%c0_66, %c0_67] : memref<128x64xbf16, #tpu.memory_space<vmem>>, vector<128x64xbf16>
    %cst_68 = arith.constant dense<0.000000e+00> : vector<8x64xf32>
    %141 = tpu.matmul %139, %140, %cst_68 {dimension_numbers = #tpu.dot_dimension_numbers<[1], [0], [0], [1], [0, 0, 1, 1], [], []>} : vector<8x128xbf16>, vector<128x64xbf16>, vector<8x64xf32> -> vector<8x64xf32>
    %142 = arith.addf %141, %4 : vector<8x64xf32>
    %143 = arith.truncf %142 : vector<8x64xf32> to vector<8x64xbf16>
    %c0_69 = arith.constant 0 : index
    %c0_70 = arith.constant 0 : index
    %144 = vector.load %arg21[%c0_69, %c0_70] : memref<8x64xbf16, #tpu.memory_space<vmem>>, vector<8x64xbf16>
    tpu.vector_store %arg21[%c0_69, %c0_70], %143 {strides = array<i32>} : memref<8x64xbf16, #tpu.memory_space<vmem>>, vector<8x64xbf16>,
    %c0_71 = arith.constant 0 : index
    %c0_72 = arith.constant 0 : index
    %145 = vector.load %arg3[%c0_71, %c0_72] : memref<1x64xf32, #tpu.memory_space<vmem>>, vector<1x64xf32>
    %146 = arith.mulf %142, %142 : vector<8x64xf32>
    %cst_73 = arith.constant dense<0.000000e+00> : vector<8xf32>
    %147 = vector.multi_reduction <add>, %146, %cst_73 [1] : vector<8x64xf32> to vector<8xf32>
    %148 = vector.shape_cast %147 : vector<8xf32> to vector<8x1xf32>
    %cst_74 = arith.constant 6.400000e+01 : f32
    %149 = vector.broadcast %cst_74 : f32 to vector<8x1xf32>
    %150 = arith.divf %148, %149 : vector<8x1xf32>
    %cst_75 = arith.constant 9.99999997E-7 : f32
    %151 = vector.broadcast %cst_75 : f32 to vector<8x1xf32>
    %152 = arith.addf %150, %151 : vector<8x1xf32>
    %153 = math.rsqrt %152 : vector<8x1xf32>
    %154 = vector.broadcast %153 : vector<8x1xf32> to vector<8x64xf32>
    %155 = arith.mulf %142, %154 : vector<8x64xf32>
    %156 = vector.broadcast %145 : vector<1x64xf32> to vector<8x64xf32>
    %157 = arith.mulf %155, %156 : vector<8x64xf32>
    %158 = arith.truncf %157 : vector<8x64xf32> to vector<8x64xbf16>
    %c0_76 = arith.constant 0 : index
    %c0_77 = arith.constant 0 : index
    %159 = vector.load %arg8[%c0_76, %c0_77] : memref<64x256xbf16, #tpu.memory_space<vmem>>, vector<64x256xbf16>
    %cst_78 = arith.constant dense<0.000000e+00> : vector<8x256xf32>
    %160 = tpu.matmul %158, %159, %cst_78 {dimension_numbers = #tpu.dot_dimension_numbers<[1], [0], [0], [1], [0, 0, 1, 1], [], []>} : vector<8x64xbf16>, vector<64x256xbf16>, vector<8x256xf32> -> vector<8x256xf32>
    %161 = vector.extract_strided_slice %160 {offsets = [0, 0], sizes = [8, 128], strides = [1, 1]} : vector<8x256xf32> to vector<8x128xf32>
    %162 = vector.extract_strided_slice %160 {offsets = [0, 128], sizes = [8, 128], strides = [1, 1]} : vector<8x256xf32> to vector<8x128xf32>
    %163 = arith.negf %161 : vector<8x128xf32>
    %164 = math.exp %163 : vector<8x128xf32>
    %cst_79 = arith.constant 1.000000e+00 : f32
    %165 = vector.broadcast %cst_79 : f32 to vector<8x128xf32>
    %166 = arith.addf %165, %164 : vector<8x128xf32>
    %167 = arith.divf %165, %166 : vector<8x128xf32>
    %168 = arith.mulf %161, %167 : vector<8x128xf32>
    %169 = arith.mulf %168, %162 : vector<8x128xf32>
    %170 = arith.truncf %169 : vector<8x128xf32> to vector<8x128xbf16>
    %c0_80 = arith.constant 0 : index
    %c0_81 = arith.constant 0 : index
    %171 = vector.load %arg9[%c0_80, %c0_81] : memref<128x64xbf16, #tpu.memory_space<vmem>>, vector<128x64xbf16>
    %cst_82 = arith.constant dense<0.000000e+00> : vector<8x64xf32>
    %172 = tpu.matmul %170, %171, %cst_82 {dimension_numbers = #tpu.dot_dimension_numbers<[1], [0], [0], [1], [0, 0, 1, 1], [], []>} : vector<8x128xbf16>, vector<128x64xbf16>, vector<8x64xf32> -> vector<8x64xf32>
    %173 = arith.truncf %172 : vector<8x64xf32> to vector<8x64xbf16>
    %c0_83 = arith.constant 0 : index
    %c0_84 = arith.constant 0 : index
    %174 = vector.load %arg20[%c0_83, %c0_84] : memref<8x64xbf16, #tpu.memory_space<vmem>>, vector<8x64xbf16>
    tpu.vector_store %arg20[%c0_83, %c0_84], %173 {strides = array<i32>} : memref<8x64xbf16, #tpu.memory_space<vmem>>, vector<8x64xbf16>,
    return
  }
}

</mosaic_0001>

<bundles_post_ra>
// kernel: tile.44
= control target key start
LH: loop header
LB: loop body
LE: loop exit
PB: predicated region body
PF: predicated region fallthrough
CT: control target
= control target key end

     0   :  { %vm43_vm0 = vcmask 1047556   ;;  %vm45_vm1 = vcmask 261120   ;;  %s94_s22 = smov 32   ;;  %s95_s25 = smov 64   ;;  %vm55_vm2 = vcmask 1048320   ;;  %vm65_vm3 = vcmask 785920   ;;  %s147_s0 = inlined_call_operand.vmem [shape: f32[8,4,32], index: 0, kind: input, shape index: {}]   ;;  %s148_s1 = inlined_call_operand.vmem [shape: f32[8,128], index: 1, kind: output, shape index: {}]  }
   0x1   :  { %v83_v0 = vld [vmem:[%s147_s0 + $0x1c] sm:$0xf]  ;;  %v84_v1 = vld [vmem:[%s147_s0 + $0x18] sm:$0xf]  ;;  %v85_v2 = vld [vmem:[%s147_s0 + $0x14] sm:$0xf] }
   0x2   :  { %9 = vst [vmem:[#allocation0 + $0x38] sm:$0xf] %v83_v0  ;;  %14 = vst [vmem:[#allocation0 + $0x30] sm:$0xf] %v84_v1  ;;  %v86_v3 = vld [vmem:[%s147_s0 + $0x10] sm:$0xf] }
   0x3   :  { %19 = vst [vmem:[#allocation0 + $0x28] sm:$0xf] %v85_v2  ;;  %v87_v4 = vld [vmem:[%s147_s0 + $0xc] sm:$0xf]  ;;  %v88_v5 = vld [vmem:[%s147_s0 + $0x8] sm:$0xf] }
   0x4   :  { %24 = vst [vmem:[#allocation0 + $0x20] sm:$0xf] %v86_v3  ;;  %29 = vst [vmem:[#allocation0 + $0x18] sm:$0xf] %v87_v4  ;;  %v89_v6 = vld [vmem:[%s147_s0 + $0x4] sm:$0xf] }
   0x5   :  { %34 = vst [vmem:[#allocation0 + $0x10] sm:$0xf] %v88_v5  ;;  %v39_v7 = vld [vmem:[%s147_s0] sm:$0xf]  ;;  %38 = vst [vmem:[#allocation0 + $0x8] sm:$0xf] %v89_v6 }
   0x6   :  { %40 = vst [vmem:[#allocation0] sm:$0xf] %v39_v7  ;;  %s93_s0 = smov 96   ;;  %vm75_vm4 = vcmask 523520  }
   0xb   :  { %v50_v8 = vld [vmem:[#allocation0 + $0x3] ss:$8 sm:$0xf0]   ;;  %v60_v9 = vld [vmem:[#allocation0 + $0x2] ss:$8 sm:$0xf0]  }
   0xc   :  { %v70_v14 = vld [vmem:[#allocation0 + $0x1] ss:$8 sm:$0xf0]   ;;  %v42_v17 = vld [vmem:[#allocation0] ss:$8 sm:$0xf0]  }
   0xd   :  { %v48_v10 = vld [vmem:[#allocation0 + $0x3] ss:$8 sm:$0xf]   ;;  %v58_v11 = vld [vmem:[#allocation0 + $0x2] ss:$8 sm:$0xf]  }
   0xe   :  { %v52_v12 = vsel %vm43_vm0, %v50_v8, %v48_v10  ;;  %v68_v13 = vld [vmem:[#allocation0 + $0x1] ss:$8 sm:$0xf]   ;;  %v41_v16 = vld [vmem:[#allocation0] ss:$8 sm:$0xf]   ;;  %v62_v18 = vsel %vm43_vm0, %v60_v9, %v58_v11 }
   0xf   :  { %53 = vrot.lane.b32.xlu0 %v52_v12, %s93_s0  ;;  %v72_v15 = vsel %vm43_vm0, %v70_v14, %v68_v13  ;;  %v44_v19 = vsel %vm43_vm0, %v42_v17, %v41_v16 }
  0x10   :  { %73 = vrot.lane.b32.xlu1 %v72_v15, %s94_s22  ;;  %46 = vst.msk [vmem:[%s148_s1] sm:$0xff] %vm45_vm1, %v44_v19  }
  0x13   :  { %63 = vrot.lane.b32.xlu0 %v62_v18, %s95_s25 }
  0x81   :  { %v54_v20 = vpop.permute.xlu0 %53  }
  0x82   :  { %56 = vst.msk [vmem:[%s148_s1] sm:$0xff] %vm55_vm2, %v54_v20   ;;  %v74_v21 = vpop.permute.xlu1 %73  }
  0x85   :  { %v64_v22 = vpop.permute.xlu0 %63  }
  0x86   :  { %66 = vst.msk [vmem:[%s148_s1] sm:$0xff] %vm65_vm3, %v64_v22  }
  0x87   :  { %76 = vst.msk [vmem:[%s148_s1] sm:$0xff] %vm75_vm4, %v74_v21  }

// kernel: tile.54
= control target key start
LH: loop header
LB: loop body
LE: loop exit
PB: predicated region body
PF: predicated region fallthrough
CT: control target
= control target key end

     0   :  { %vm43_vm0 = vcmask 1047556   ;;  %vm45_vm1 = vcmask 261120   ;;  %vm55_vm2 = vcmask 523520   ;;  %s112_s0 = inlined_call_operand.vmem [shape: f32[8,2,32], index: 0, kind: input, shape index: {}]   ;;  %s113_s1 = inlined_call_operand.vmem [shape: f32[8,64], index: 1, kind: output, shape index: {}]  }
   0x1   :  { %v63_v0 = vld [vmem:[%s112_s0 + $0xe] sm:$0x3]  ;;  %v64_v1 = vld [vmem:[%s112_s0 + $0xc] sm:$0x3]  ;;  %v65_v2 = vld [vmem:[%s112_s0 + $0xa] sm:$0x3] }
   0x2   :  { %9 = vst [vmem:[#allocation0 + $0x38] sm:$0x3] %v63_v0  ;;  %14 = vst [vmem:[#allocation0 + $0x30] sm:$0x3] %v64_v1  ;;  %v66_v3 = vld [vmem:[%s112_s0 + $0x8] sm:$0x3] }
   0x3   :  { %19 = vst [vmem:[#allocation0 + $0x28] sm:$0x3] %v65_v2  ;;  %v67_v4 = vld [vmem:[%s112_s0 + $0x6] sm:$0x3]  ;;  %v68_v5 = vld [vmem:[%s112_s0 + $0x4] sm:$0x3] }
   0x4   :  { %24 = vst [vmem:[#allocation0 + $0x20] sm:$0x3] %v66_v3  ;;  %29 = vst [vmem:[#allocation0 + $0x18] sm:$0x3] %v67_v4  ;;  %v69_v6 = vld [vmem:[%s112_s0 + $0x2] sm:$0x3] }
   0x5   :  { %34 = vst [vmem:[#allocation0 + $0x10] sm:$0x3] %v68_v5  ;;  %v39_v7 = vld [vmem:[%s112_s0] sm:$0x3]  ;;  %38 = vst [vmem:[#allocation0 + $0x8] sm:$0x3] %v69_v6 }
   0x6   :  { %40 = vst [vmem:[#allocation0] sm:$0x3] %v39_v7  ;;  %s71_s0 = smov 32  }
   0xb   :  { %v42_v8 = vld [vmem:[#allocation0] ss:$8 sm:$0xf0]   ;;  %v50_v9 = vld [vmem:[#allocation0 + $0x1] ss:$8 sm:$0xf0]  }
   0xd   :  { %v41_v10 = vld [vmem:[#allocation0] ss:$8 sm:$0xf]   ;;  %v48_v11 = vld [vmem:[#allocation0 + $0x1] ss:$8 sm:$0xf]  }
   0xe   :  { %v44_v12 = vsel %vm43_vm0, %v42_v8, %v41_v10  ;;  %v52_v13 = vsel %vm43_vm0, %v50_v9, %v48_v11 }
   0xf   :  { %53 = vrot.lane.b32.xlu0 %v52_v13, %s71_s0  ;;  %46 = vst.msk [vmem:[%s113_s1] sm:$0xff] %vm45_vm1, %v44_v12  }
  0x81   :  { %v54_v14 = vpop.permute.xlu0 %53  }
  0x82   :  { %56 = vst.msk [vmem:[%s113_s1] sm:$0xff] %vm55_vm2, %v54_v14  }

// kernel: tile.63
= control target key start
LH: loop header
LB: loop body
LE: loop exit
PB: predicated region body
PF: predicated region fallthrough
CT: control target
= control target key end

     0   :  { %s22_s0 = inlined_call_operand.vmem [shape: f32[32], index: 0, kind: input, shape index: {}]   ;;  %s23_s1 = inlined_call_operand.vmem [shape: f32[4,32], index: 1, kind: output, shape index: {}]  }
   0x1   :  { %v4_v0 = vld [vmem:[%s22_s0] ss:$0 sm:$0xff] }
   0x2   :  { %5 = vst [vmem:[%s23_s1] sm:$0xf] %v4_v0 }

// kernel: tile.64
= control target key start
LH: loop header
LB: loop body
LE: loop exit
PB: predicated region body
PF: predicated region fallthrough
CT: control target
= control target key end

     0   :  { %vm8_vm0 = vcmask 261120   ;;  %s40_s8 = smov 32   ;;  %s41_s9 = smov 64   ;;  %vm14_vm1 = vcmask 1048320   ;;  %vm20_vm2 = vcmask 785920   ;;  %vm26_vm3 = vcmask 523520   ;;  %s58_s0 = inlined_call_operand.vmem [shape: f32[4,32], index: 0, kind: input, shape index: {}]   ;;  %s59_s1 = inlined_call_operand.vmem [shape: f32[1,128], index: 1, kind: output, shape index: {}]  }
   0x1   :  { %v5_v0 = vld [vmem:[%s58_s0] sm:$0xf]  ;;  %s39_s0 = smov 96  }
   0x2   :  { %6 = vst [vmem:[#allocation1] sm:$0xf] %v5_v0 }
   0x9   :  { %v11_v1 = vld [vmem:[#allocation1 + $0x3] sm:$0x1]   ;;  %v23_v2 = vld [vmem:[#allocation1 + $0x1] sm:$0x1]   ;;  %v7_v3 = vld [vmem:[#allocation1] sm:$0x1]  }
   0xa   :  { %12 = vrot.lane.b32.xlu0 %v11_v1, %s39_s0  ;;  %24 = vrot.lane.b32.xlu1 %v23_v2, %s40_s8  ;;  %v17_v4 = vld [vmem:[#allocation1 + $0x2] sm:$0x1]   ;;  %9 = vst.msk [vmem:[#allocation0] sm:$0x1] %vm8_vm0, %v7_v3  }
   0xe   :  { %18 = vrot.lane.b32.xlu0 %v17_v4, %s41_s9 }
  0x7c   :  { %v13_v5 = vpop.permute.xlu0 %12   ;;  %v25_v6 = vpop.permute.xlu1 %24  }
  0x7d   :  { %15 = vst.msk [vmem:[#allocation0] sm:$0x1] %vm14_vm1, %v13_v5  }
  0x80   :  { %v19_v7 = vpop.permute.xlu0 %18  }
  0x81   :  { %21 = vst.msk [vmem:[#allocation0] sm:$0x1] %vm20_vm2, %v19_v7  }
  0x82   :  { %27 = vst.msk [vmem:[#allocation0] sm:$0x1] %vm26_vm3, %v25_v6  }
  0x89   :  { %v32_v8 = vld [vmem:[#allocation0] sm:$0x1] }
  0x8a   :  { %35 = vst [vmem:[%s59_s1] sm:$0x1] %v32_v8 }

// kernel: tile.68
= control target key start
LH: loop header
LB: loop body
LE: loop exit
PB: predicated region body
PF: predicated region fallthrough
CT: control target
= control target key end

     0   :  { %s22_s0 = inlined_call_operand.vmem [shape: f32[32], index: 0, kind: input, shape index: {}]   ;;  %s23_s1 = inlined_call_operand.vmem [shape: f32[2,32], index: 1, kind: output, shape index: {}]  }
   0x1   :  { %v4_v0 = vld [vmem:[%s22_s0] ss:$0 sm:$0xff] }
   0x2   :  { %5 = vst [vmem:[%s23_s1] sm:$0x3] %v4_v0 }

// kernel: tile.69
= control target key start
LH: loop header
LB: loop body
LE: loop exit
PB: predicated region body
PF: predicated region fallthrough
CT: control target
= control target key end

     0   :  { %vm8_vm0 = vcmask 261120   ;;  %vm14_vm1 = vcmask 523520   ;;  %s42_s0 = inlined_call_operand.vmem [shape: f32[2,32], index: 0, kind: input, shape index: {}]   ;;  %s43_s1 = inlined_call_operand.vmem [shape: f32[1,64], index: 1, kind: output, shape index: {}]  }
   0x1   :  { %v5_v0 = vld [vmem:[%s42_s0] sm:$0x3]  ;;  %s25_s0 = smov 32  }
   0x2   :  { %6 = vst [vmem:[#allocation1] sm:$0x3] %v5_v0 }
   0x9   :  { %v11_v1 = vld [vmem:[#allocation1 + $0x1] sm:$0x1]   ;;  %v7_v2 = vld [vmem:[#allocation1] sm:$0x1]  }
   0xa   :  { %12 = vrot.lane.b32.xlu0 %v11_v1, %s25_s0  ;;  %9 = vst.msk [vmem:[#allocation0] sm:$0x1] %vm8_vm0, %v7_v2  }
  0x7c   :  { %v13_v3 = vpop.permute.xlu0 %12  }
  0x7d   :  { %15 = vst.msk [vmem:[#allocation0] sm:$0x1] %vm14_vm1, %v13_v3  }
  0x84   :  { %v20_v4 = vld [vmem:[#allocation0] sm:$0x1] }
  0x85   :  { %23 = vst [vmem:[%s43_s1] sm:$0x1] %v20_v4 }

// kernel: qwen3_forward.5
= control target key start
LH: loop header
LB: loop body
LE: loop exit
PB: predicated region body
PF: predicated region fallthrough
CT: control target
= control target key end

     0   :  { %s112_s0 = inlined_call_operand.vmem [shape: bf16[8,64], index: 0, kind: input, shape index: {}]   ;;  %s113_s1 = inlined_call_operand.vmem [shape: bf16[8,64], index: 1, kind: input, shape index: {}]   ;;  %s114_s2 = inlined_call_operand.vmem [shape: f32[1,64], index: 2, kind: input, shape index: {}]   ;;  %s115_s3 = inlined_call_operand.hbm [shape: f32[8,64], index: 3, kind: output, shape index: {}]  }
   0x1   :  { %v15_v0 = vld [vmem:[%s112_s0] sm:$0xf] }
   0x2   :  { %v17_v1 = vld [vmem:[%s113_s1] sm:$0xf]  ;;  %v16_v2 = vunpack.c.l.bf16 %v15_v0 }
   0x3   :  { %v18_v3 = vunpack.c.l.bf16 %v17_v1 }
   0x4   :  { %8 = vsyncpa [#allocation3], 0  ;;  %vm22_vm0 = vcmask 523264   ;;  %v53_v11 = vld [vmem:[%s114_s2] ss:$0 sm:$0xff]  ;;  %s79_s0 = smov [#allocation2]  }
   0x5   :  { %v19_v4 = vadd.f32 %v18_v3, %v16_v2  ;;  %s45_s18 = sshll.u32 %s79_s0, 4  ;;  %s46_s18 = int_to_ptr.vmem [resolvable:$true] %s45_s18 }
   0x6   :  { %s57_s1 = scalar_lea.vmem %s46_s18, 128  ;;  %p62_p1 = scmp.lt.s32.totalorder %s46_s18, %s46_s18 }
   0x7   :  { %v21_v5 = vmul.f32 %v19_v4, %v19_v4  ;;  %p58_p0 = scmp.ne.s32.totalorder %s46_s18, %s57_s1  ;;  %p63_p2 = scmp.lt.s32.totalorder %s57_s1, %s57_s1 }
   0x9   :  { %v23_v6 = vsel %vm22_vm0, %v21_v5, 0.0  ;;  %p64_p3 = por %p63_p2, %p62_p1 }
   0xa   :  { %24 = vadd.xlane.f32.xlu0 %v23_v6 }
   0xb   :  { %p65_p4 = pnand %p64_p3, %p58_p0 }
  0x93   :  { %v25_v7 = vpop.xlane.xlu0 %24 }
  0x94   :  { %v27_v8 = vmul.f32 0.015625, %v25_v7 }
  0x96   :  { %v28_v9 = vadd.f32 1e-06, %v27_v8 }
  0x98   :  { %55 = vrsqrt.f32 %v28_v9 }
  0xa5   :  { %v56_v10 = vpop.eup %55 }
  0xa6   :  { %v30_v12 = vmul.f32 %v56_v10, %v19_v4 }
  0xa8   :  { %v37_v13 = vmul.f32 %v53_v11, %v30_v12 }
  0xaa   :  { %38 = vst.msk [vmem:[#allocation2] sm:$0xff] %vm22_vm0, %v37_v13 }
  0xab   :  { %68 = shalt.err (!%p65_p4)
}
  0xac   :  { %48 = dma.vmem_to_hbm [thread:$0]  %s46_s18, 128, %s115_s3, [#allocation3]  }
  0xad   :  { %77 = dma.done.wait [#allocation3], 128  }
  0xae   :  { %78 = vsyncadd [#allocation3], 4294967168 }
  0xaf   :  { %52 = vsyncpa [#allocation3], 1 }

// kernel: qwen3_forward.3
= control target key start
LH: loop header
LB: loop body
LE: loop exit
PB: predicated region body
PF: predicated region fallthrough
CT: control target
= control target key end

     0   :  { %vm75_vm0 = vcmask 523264   ;;  %v2148_v7 = vmov 0.0   ;;  %vm2149_vm1 = vmmov 0   ;;  %s2151_s25 = smov 64   ;;  %vm682_vm2 = vcmask 261120   ;;  %s2738_s0 = inlined_call_operand.vmem [shape: bf16[8,64], index: 0, kind: input, shape index: {}, may-alias: {0,20}]   ;;  %s2739_s1 = inlined_call_operand.vmem [shape: bf16[8,64], index: 1, kind: input, shape index: {}, may-alias: {1,21}]   ;;  %s2740_s4 = inlined_call_operand.vmem [shape: bf16[64,128], index: 4, kind: input, shape index: {}]   ;;  %s2741_s5 = inlined_call_operand.vmem [shape: bf16[64,64], index: 5, kind: input, shape index: {}]   ;;  %s2742_s6 = inlined_call_operand.vmem [shape: bf16[64,64], index: 6, kind: input, shape index: {}]   ;;  %s2743_s2 = inlined_call_operand.vmem [shape: f32[1,64], index: 2, kind: input, shape index: {}]   ;;  %s2744_s12 = inlined_call_operand.vmem [shape: f32[128,128], index: 12, kind: input, shape index: {}]   ;;  %s2745_s14 = inlined_call_operand.vmem [shape: f32[128,128], index: 14, kind: input, shape index: {}]   ;;  %s2746_s13 = inlined_call_operand.vmem [shape: f32[64,64], index: 13, kind: input, shape index: {}]   ;;  %s2747_s10 = inlined_call_operand.vmem [shape: f32[1,128], index: 10, kind: input, shape index: {}]   ;;  %s2748_s15 = inlined_call_operand.vmem [shape: f32[64,64], index: 15, kind: input, shape index: {}]   ;;  %s2749_s11 = inlined_call_operand.vmem [shape: f32[1,64], index: 11, kind: input, shape index: {}]   ;;  %s2750_s16 = inlined_call_operand.vmem [shape: f32[8,128], index: 16, kind: input, shape index: {}]   ;;  %s2751_s17 = inlined_call_operand.vmem [shape: f32[8,128], index: 17, kind: input, shape index: {}]   ;;  %s2752_s18 = inlined_call_operand.vmem [shape: f32[8,64], index: 18, kind: input, shape index: {}]   ;;  %s2753_s19 = inlined_call_operand.vmem [shape: f32[8,64], index: 19, kind: input, shape index: {}]   ;;  %s2754_s7 = inlined_call_operand.vmem [shape: bf16[128,64], index: 7, kind: input, shape index: {}]   ;;  %s2755_s21 = inlined_call_operand.vmem [shape: bf16[8,64], index: 21, kind: output, shape index: {1}, may-alias: {1,21}]   ;;  %s2756_s8 = inlined_call_operand.vmem [shape: bf16[64,256], index: 8, kind: input, shape index: {}]   ;;  %s2757_s3 = inlined_call_operand.vmem [shape: f32[1,64], index: 3, kind: input, shape index: {}]   ;;  %s2758_s9 = inlined_call_operand.vmem [shape: bf16[128,64], index: 9, kind: input, shape index: {}]   ;;  %s2759_s20 = inlined_call_operand.vmem [shape: bf16[8,64], index: 20, kind: output, shape index: {0}, may-alias: {0,20}]  }
   0x1   :  { %2764 = sst [smem:[#allocation2_spill]] %s2738_s0  ;;  %1850 = vmatprep.subr.bf16.mxu0 %v2148_v7  ;;  %1862 = vmatprep.subr.bf16.mxu1 %v2148_v7  ;;  %v326_v25 = vld [vmem:[%s2744_s12 + $0x78] sm:$0xff]  ;;  %v325_v27 = vld [vmem:[%s2744_s12 + $0x70] sm:$0xff]  ;;  %v324_v28 = vld [vmem:[%s2744_s12 + $0x68] sm:$0xff]  ;;  %vm761_vm4 = vcmask 64512   ;;  %vm1348_vm5 = vcmask 785408  }
   0x2   :  { %2765 = sst [smem:[#allocation3_spill]] %s2739_s1  ;;  %1858 = vmatprep.mubr.msk.bf16.mxu0 %vm2149_vm1, %v2148_v7  ;;  %1870 = vmatprep.mubr.msk.bf16.mxu1 %vm2149_vm1, %v2148_v7  ;;  %v323_v30 = vld [vmem:[%s2744_s12 + $0x60] sm:$0xff]  ;;  %v322_v31 = vld [vmem:[%s2744_s12 + $0x58] sm:$0xff]  ;;  %v321_v33 = vld [vmem:[%s2744_s12 + $0x50] sm:$0xff]  ;;  %vm1456_vm6 = vcmask 519168  }
   0x3   :  { %2766 = sst [smem:[#allocation4_spill]] %s2740_s4  ;;  %v320_v34 = vld [vmem:[%s2744_s12 + $0x48] sm:$0xff]  ;;  %v319_v35 = vld [vmem:[%s2744_s12 + $0x40] sm:$0xff]  ;;  %v318_v36 = vld [vmem:[%s2744_s12 + $0x38] sm:$0xff] }
   0x4   :  { %2767 = sst [smem:[#allocation5_spill]] %s2741_s5  ;;  %v317_v37 = vld [vmem:[%s2744_s12 + $0x30] sm:$0xff]  ;;  %v316_v38 = vld [vmem:[%s2744_s12 + $0x28] sm:$0xff]  ;;  %v315_v39 = vld [vmem:[%s2744_s12 + $0x20] sm:$0xff] }
   0x5   :  { %2768 = sst [smem:[#allocation6_spill]] %s2742_s6  ;;  %v314_v40 = vld [vmem:[%s2744_s12 + $0x18] sm:$0xff]  ;;  %v313_v41 = vld [vmem:[%s2744_s12 + $0x10] sm:$0xff]  ;;  %v312_v42 = vld [vmem:[%s2744_s12 + $0x8] sm:$0xff] }
   0x6   :  { %2769 = sst [smem:[#allocation7_spill]] %s2743_s2  ;;  %v311_v43 = vld [vmem:[%s2744_s12] sm:$0xff]  ;;  %v342_v44 = vld [vmem:[%s2745_s14 + $0x78] sm:$0xff]  ;;  %v341_v45 = vld [vmem:[%s2745_s14 + $0x70] sm:$0xff] }
   0x7   :  { %2770 = sst [smem:[#allocation8_spill]] %s2754_s7  ;;  %v340_v46 = vld [vmem:[%s2745_s14 + $0x68] sm:$0xff]  ;;  %v339_v47 = vld [vmem:[%s2745_s14 + $0x60] sm:$0xff]  ;;  %v338_v48 = vld [vmem:[%s2745_s14 + $0x58] sm:$0xff] }
   0x8   :  { %s2771_s26 = sld [smem:[#allocation2_spill]]  ;;  %v337_v49 = vld [vmem:[%s2745_s14 + $0x50] sm:$0xff]  ;;  %v506_v53 = vld [vmem:[%s2746_s13 + $0x38] sm:$0xff]  ;;  %v504_v59 = vld [vmem:[%s2746_s13 + $0x28] sm:$0xff] }
   0x9   :  { %s2772_s7 = sld [smem:[#allocation3_spill]]  ;;  %v505_v56 = vld [vmem:[%s2746_s13 + $0x30] sm:$0xff]  ;;  %v503_v62 = vld [vmem:[%s2746_s13 + $0x20] sm:$0xff]  ;;  %v502_v63 = vld [vmem:[%s2746_s13 + $0x18] sm:$0xff] }
   0xa   :  { %s2773_s0 = sld [smem:[#allocation4_spill]] }
   0xb   :  { %s2774_s30 = sld [smem:[#allocation5_spill]] }
   0xc   :  { %s2775_s6 = sld [smem:[#allocation7_spill]] }
   0xd   :  { %s2776_s22 = sld [smem:[#allocation6_spill]] }
   0xe   :  { %v68_v0 = vld [vmem:[%s2771_s26] sm:$0xf]  ;;  %s2777_s27 = sld [smem:[#allocation8_spill]] }
   0xf   :  { %v70_v1 = vld [vmem:[%s2772_s7] sm:$0xf]  ;;  %v69_v2 = vunpack.c.l.bf16 %v68_v0  ;;  %v501_v0 = vld [vmem:[%s2746_s13 + $0x10] sm:$0xff] }
  0x10   :  { %v71_v3 = vunpack.c.l.bf16 %v70_v1  ;;  %v2080_v8 = vld [vmem:[%s2773_s0 + $0x18] sm:$0xff]   ;;  %v2082_v10 = vld [vmem:[%s2773_s0 + $0x10] sm:$0xff]   ;;  %v2084_v12 = vld [vmem:[%s2773_s0 + $0x8] sm:$0xff]  }
  0x11   :  { %v2081_v9 = vld [vmem:[%s2774_s30 + $0x18] sm:$0xff]   ;;  %1851 = vmatpush3.bf16.msra.mxu0 %v2080_v8  ;;  %v2083_v11 = vld [vmem:[%s2774_s30 + $0x10] sm:$0xff]   ;;  %v2085_v13 = vld [vmem:[%s2774_s30 + $0x8] sm:$0xff]  }
  0x12   :  { %v2270_v4 = vadd.f32 %v71_v3, %v69_v2  ;;  %1863 = vmatpush3.bf16.msra.mxu1 %v2081_v9  ;;  %1852 = vmatprep.subr.bf16.mxu0 %v2148_v7  ;;  %v2086_v14 = vld [vmem:[%s2773_s0] sm:$0xff]   ;;  %v500_v1 = vld [vmem:[%s2746_s13 + $0x8] sm:$0xff] }
  0x13   :  { %1864 = vmatprep.subr.bf16.mxu1 %v2148_v7  ;;  %v2087_v15 = vld [vmem:[%s2774_s30] sm:$0xff]   ;;  %v2088_v23 = vld [vmem:[%s2776_s22 + $0x18] sm:$0xff]   ;;  %v2089_v26 = vld [vmem:[%s2776_s22 + $0x10] sm:$0xff]  }
  0x14   :  { %v74_v5 = vmul.f32 %v2270_v4, %v2270_v4  ;;  %v1690_v20 = vld [vmem:[%s2775_s6] ss:$0 sm:$0xff]  ;;  %v2090_v29 = vld [vmem:[%s2776_s22 + $0x8] sm:$0xff]  }
  0x15   :  { %1853 = vmatpush3.bf16.msra.mxu0 %v2082_v10  ;;  %v2091_v32 = vld [vmem:[%s2776_s22] sm:$0xff]   ;;  %v336_v10 = vld [vmem:[%s2745_s14 + $0x48] sm:$0xff] }
  0x16   :  { %v76_v6 = vsel %vm75_vm0, %v74_v5, 0.0  ;;  %1865 = vmatpush3.bf16.msra.mxu1 %v2083_v11  ;;  %1854 = vmatprep.subr.bf16.mxu0 %v2148_v7  ;;  %v499_v2 = vld [vmem:[%s2746_s13] sm:$0xff] }
  0x17   :  { %77 = vadd.xlane.f32.xlu0 %v76_v6  ;;  %1866 = vmatprep.subr.bf16.mxu1 %v2148_v7  ;;  %v335_v11 = vld [vmem:[%s2745_s14 + $0x40] sm:$0xff] }
  0x19   :  { %1855 = vmatpush3.bf16.msra.mxu0 %v2084_v12  ;;  %v334_v12 = vld [vmem:[%s2745_s14 + $0x38] sm:$0xff] }
  0x1a   :  { %1867 = vmatpush3.bf16.msra.mxu1 %v2085_v13  ;;  %1856 = vmatprep.subr.bf16.mxu0 %v2148_v7  ;;  %v333_v13 = vld [vmem:[%s2745_s14 + $0x30] sm:$0xff] }
  0x1b   :  { %1868 = vmatprep.subr.bf16.mxu1 %v2148_v7 }
  0x1d   :  { %1857 = vmatpush3.bf16.msra.mxu0 %v2086_v14  ;;  %v332_v14 = vld [vmem:[%s2745_s14 + $0x28] sm:$0xff] }
  0x1e   :  { %1869 = vmatpush3.bf16.msra.mxu1 %v2087_v15  ;;  %1874 = vmatprep.subr.bf16.mxu0 %v2148_v7  ;;  %v331_v15 = vld [vmem:[%s2745_s14 + $0x20] sm:$0xff] }
  0x1f   :  { %1886 = vmatprep.subr.mxu1 %v2148_v7 }
  0xa0   :  { %v78_v16 = vpop.xlane.xlu0 %77 }
  0xa1   :  { %v80_v17 = vmul.f32 0.015625, %v78_v16  ;;  %v330_v16 = vld [vmem:[%s2745_s14 + $0x18] sm:$0xff] }
  0xa3   :  { %v81_v18 = vadd.f32 1e-06, %v80_v17  ;;  %v329_v17 = vld [vmem:[%s2745_s14 + $0x10] sm:$0xff] }
  0xa5   :  { %2120 = vrsqrt.f32 %v81_v18  ;;  %v328_v18 = vld [vmem:[%s2745_s14 + $0x8] sm:$0xff] }
  0xb2   :  { %v2121_v19 = vpop.eup %2120 }
  0xb3   :  { %v83_v21 = vmul.f32 %v2121_v19, %v2270_v4  ;;  %v327_v19 = vld [vmem:[%s2745_s14] sm:$0xff]  ;;  %s2150_s14 = smov 96  }
  0xb5   :  { %v90_v22 = vmul.f32 %v1690_v20, %v83_v21 }
  0xb7   :  { %v91_v24 = vpack.c.bf16 %v90_v22, %v90_v22 }
  0xb9   :  { %1859 = vmatmul.mubr.msk.bf16.vlgmr.msra.gmra.mxu0 %vm75_vm0, %v91_v24  ;;  %1871 = vmatmul.mubr.msk.bf16.vlgmr.msra.gmra.mxu1 %vm75_vm0, %v91_v24 }
  0xba   :  { %1875 = vmatpush3.bf16.msra.mxu0 %v2088_v23  ;;  %1882 = vmatprep.mubr.msk.bf16.mxu0 %vm2149_vm1, %v2148_v7 }
  0xbb   :  { %1876 = vmatprep.subr.bf16.mxu0 %v2148_v7  ;;  %1887 = vmatpush3.msra.mxu1 %v326_v25  ;;  %v1706_v25 = vld [vmem:[%s2747_s10] ss:$0 sm:$0xff] }
  0xbc   :  { %1888 = vmatprep.subr.mxu1 %v2148_v7  ;;  %1918 = vmatprep.mubr.msk.f32.mxu1 %vm2149_vm1, %v2148_v7 }
  0xbd   :  { %1889 = vmatpush3.msra.mxu1 %v325_v27 }
  0xbe   :  { %1877 = vmatpush3.bf16.msra.mxu0 %v2089_v26  ;;  %1890 = vmatprep.subr.mxu1 %v2148_v7 }
  0xbf   :  { %1878 = vmatprep.subr.bf16.mxu0 %v2148_v7  ;;  %1891 = vmatpush3.msra.mxu1 %v324_v28 }
  0xc0   :  { %1892 = vmatprep.subr.mxu1 %v2148_v7 }
  0xc1   :  { %1893 = vmatpush3.msra.mxu1 %v323_v30  ;;  %v514_v30 = vld [vmem:[%s2748_s15 + $0x38] sm:$0xff] }
  0xc2   :  { %1879 = vmatpush3.bf16.msra.mxu0 %v2090_v29  ;;  %1894 = vmatprep.subr.mxu1 %v2148_v7 }
  0xc3   :  { %1880 = vmatprep.subr.bf16.mxu0 %v2148_v7  ;;  %1895 = vmatpush3.msra.mxu1 %v322_v31  ;;  %v513_v31 = vld [vmem:[%s2748_s15 + $0x30] sm:$0xff] }
  0xc4   :  { %1896 = vmatprep.subr.mxu1 %v2148_v7 }
  0xc5   :  { %1897 = vmatpush3.msra.mxu1 %v321_v33  ;;  %v511_v33 = vld [vmem:[%s2748_s15 + $0x20] sm:$0xff] }
  0xc6   :  { %1881 = vmatpush3.bf16.msra.mxu0 %v2091_v32  ;;  %1898 = vmatprep.subr.mxu1 %v2148_v7  ;;  %v512_v32 = vld [vmem:[%s2748_s15 + $0x28] sm:$0xff] }
  0xc7   :  { %1899 = vmatpush3.msra.mxu1 %v320_v34  ;;  %1921 = vmatprep.subr.mxu0 %v2148_v7  ;;  %v510_v34 = vld [vmem:[%s2748_s15 + $0x18] sm:$0xff] }
  0xc8   :  { %1900 = vmatprep.subr.mxu1 %v2148_v7 }
  0xc9   :  { %1883 = vmatmul.mubr.msk.bf16.vlgmr.msra.gmra.mxu0 %vm75_vm0, %v91_v24  ;;  %1901 = vmatpush3.msra.mxu1 %v319_v35  ;;  %v509_v35 = vld [vmem:[%s2748_s15 + $0x10] sm:$0xff] }
  0xca   :  { %1902 = vmatprep.subr.mxu1 %v2148_v7  ;;  %1953 = vmatprep.mubr.msk.f32.mxu0 %vm2149_vm1, %v2148_v7 }
  0xcb   :  { %1903 = vmatpush3.msra.mxu1 %v318_v36  ;;  %1922 = vmatpush3.msra.mxu0 %v342_v44  ;;  %v508_v36 = vld [vmem:[%s2748_s15 + $0x8] sm:$0xff] }
  0xcc   :  { %1904 = vmatprep.subr.mxu1 %v2148_v7  ;;  %1923 = vmatprep.subr.mxu0 %v2148_v7 }
  0xcd   :  { %1905 = vmatpush3.msra.mxu1 %v317_v37  ;;  %1924 = vmatpush3.msra.mxu0 %v341_v45 }
  0xce   :  { %1906 = vmatprep.subr.mxu1 %v2148_v7  ;;  %1925 = vmatprep.subr.mxu0 %v2148_v7 }
  0xcf   :  { %1907 = vmatpush3.msra.mxu1 %v316_v38  ;;  %1926 = vmatpush3.msra.mxu0 %v340_v46  ;;  %v1708_v38 = vld [vmem:[%s2749_s11] ss:$0 sm:$0xff] }
  0xd0   :  { %1908 = vmatprep.subr.mxu1 %v2148_v7  ;;  %1927 = vmatprep.subr.mxu0 %v2148_v7 }
  0xd1   :  { %1909 = vmatpush3.msra.mxu1 %v315_v39  ;;  %1928 = vmatpush3.msra.mxu0 %v339_v47  ;;  %v507_v39 = vld [vmem:[%s2748_s15] sm:$0xff] }
  0xd2   :  { %1910 = vmatprep.subr.mxu1 %v2148_v7  ;;  %1929 = vmatprep.subr.mxu0 %v2148_v7 }
  0xd3   :  { %1911 = vmatpush3.msra.mxu1 %v314_v40  ;;  %1930 = vmatpush3.msra.mxu0 %v338_v48 }
  0xd4   :  { %1912 = vmatprep.subr.mxu1 %v2148_v7  ;;  %1931 = vmatprep.subr.mxu0 %v2148_v7 }
  0xd5   :  { %1913 = vmatpush3.msra.mxu1 %v313_v41  ;;  %1932 = vmatpush3.msra.mxu0 %v337_v49  ;;  %v516_v49 = vld [vmem:[%s2752_s18] sm:$0xff] }
  0xd6   :  { %1914 = vmatprep.subr.mxu1 %v2148_v7  ;;  %1933 = vmatprep.subr.mxu0 %v2148_v7 }
  0xd7   :  { %1915 = vmatpush3.msra.mxu1 %v312_v42  ;;  %1934 = vmatpush3.msra.mxu0 %v336_v10  ;;  %v344_v42 = vld [vmem:[%s2750_s16] sm:$0xff] }
  0xd8   :  { %1916 = vmatprep.subr.mxu1 %v2148_v7  ;;  %1935 = vmatprep.subr.mxu0 %v2148_v7 }
  0xd9   :  { %1917 = vmatpush3.msra.mxu1 %v311_v43  ;;  %1936 = vmatpush3.msra.mxu0 %v335_v11  ;;  %v345_v43 = vld [vmem:[%s2751_s17] sm:$0xff]  ;;  %s2152_s17 = smov 32  }
  0xda   :  { %1956 = vmatprep.subr.mxu1 %v2148_v7  ;;  %1937 = vmatprep.subr.mxu0 %v2148_v7 }
  0xdb   :  { %1938 = vmatpush3.msra.mxu0 %v334_v12 }
  0xdc   :  { %1939 = vmatprep.subr.mxu0 %v2148_v7 }
  0xdd   :  { %1940 = vmatpush3.msra.mxu0 %v333_v13 }
  0xde   :  { %1941 = vmatprep.subr.mxu0 %v2148_v7 }
  0xdf   :  { %1942 = vmatpush3.msra.mxu0 %v332_v14 }
  0xe0   :  { %1943 = vmatprep.subr.mxu0 %v2148_v7 }
  0xe1   :  { %1944 = vmatpush3.msra.mxu0 %v331_v15 }
  0xe2   :  { %1945 = vmatprep.subr.mxu0 %v2148_v7 }
  0xe3   :  { %1946 = vmatpush3.msra.mxu0 %v330_v16 }
  0xe4   :  { %1947 = vmatprep.subr.mxu0 %v2148_v7 }
  0xe5   :  { %1948 = vmatpush3.msra.mxu0 %v329_v17 }
  0xe6   :  { %1949 = vmatprep.subr.mxu0 %v2148_v7 }
  0xe7   :  { %1950 = vmatpush3.msra.mxu0 %v328_v18 }
  0xe8   :  { %1951 = vmatprep.subr.mxu0 %v2148_v7 }
  0xe9   :  { %1952 = vmatpush3.msra.mxu0 %v327_v19 }
  0xea   :  { %1975 = vmatprep.subr.mxu0 %v2148_v7 }
 0x179   :  { %v2430_v50 = vpop.f32.mrf.mxu0  ;;  %v2432_v51 = vpop.f32.mrf.mxu1 }
 0x17a   :  { %v346_v52 = vmul.f32 %v2430_v50, %v2430_v50  ;;  %v518_v5 = vmul.f32 %v2432_v51, %v2432_v51 }
 0x17b   :  { %v1860_v54 = vpop.f32.mrf.mxu0  ;;  %v1872_v55 = vpop.f32.mrf.mxu1 }
 0x17c   :  { %1919 = vmatmul.mubr.f32.vlgmr.msra.gmra.mxu1 %v346_v52 }
 0x17d   :  { %1957 = vmatpush3.msra.mxu1 %v506_v53  ;;  %v164_v57 = vpop.f32.mrf.mxu0  ;;  %v236_v58 = vpop.f32.mrf.mxu1  ;;  %1972 = vmatprep.mubr.msk.f32.mxu1 %vm2149_vm1, %v2148_v7 }
 0x17e   :  { %1958 = vmatprep.subr.mxu1 %v2148_v7  ;;  %v677_v57 = vlaneseq }
 0x17f   :  { %1959 = vmatpush3.msra.mxu1 %v505_v56  ;;  %v1861_v60 = vpop.f32.mrf.mxu0  ;;  %v1873_v61 = vpop.f32.mrf.mxu1 }
 0x180   :  { %1960 = vmatprep.subr.mxu1 %v2148_v7  ;;  %v678_v58 = vshrl.u32 %v677_v57, 7 }
 0x181   :  { %1961 = vmatpush3.msra.mxu1 %v504_v59  ;;  %v680_v59 = vand.u32 127, %v677_v57 }
 0x182   :  { %1962 = vmatprep.subr.mxu1 %v2148_v7 }
 0x183   :  { %1963 = vmatpush3.msra.mxu1 %v503_v62  ;;  %vm681_vm3 = vcmp.le.s32.totalorder %v680_v59, %v678_v58  ;;  %v2092_v58 = vld [vmem:[%s2777_s27 + $0x38] sm:$0xff]   ;;  %v2093_v59 = vld [vmem:[%s2777_s27 + $0x30] sm:$0xff]  }
 0x184   :  { %1964 = vmatprep.subr.mxu1 %v2148_v7 }
 0x185   :  { %1965 = vmatpush3.msra.mxu1 %v502_v63 }
 0x186   :  { %1966 = vmatprep.subr.mxu1 %v2148_v7 }
 0x187   :  { %1967 = vmatpush3.msra.mxu1 %v501_v0 }
 0x188   :  { %1968 = vmatprep.subr.mxu1 %v2148_v7 }
 0x189   :  { %v2468_v3 = vpop.f32.mrf.mxu0  ;;  %1969 = vmatpush3.msra.mxu1 %v500_v1 }
 0x18a   :  { %1970 = vmatprep.subr.mxu1 %v2148_v7 }
 0x18b   :  { %v1884_v6 = vpop.f32.mrf.mxu0  ;;  %1971 = vmatpush3.msra.mxu1 %v499_v2 }
 0x18c   :  { %1973 = vmatmul.mubr.msk.f32.vlgmr.msra.gmra.mxu1 %vm75_vm0, %v518_v5  ;;  %2004 = vmatprep.subr.mxu1 %v2148_v7 }
 0x18d   :  { %v308_v8 = vpop.f32.mrf.mxu0  ;;  %2006 = vmatprep.mubr.msk.f32.mxu1 %vm2149_vm1, %v2148_v7 }
 0x18f   :  { %v1885_v9 = vpop.f32.mrf.mxu0 }
 0x23c   :  { %v413_v20 = vpop.f32.mrf.mxu1 }
 0x23d   :  { %v414_v21 = vadd.f32 1e-06, %v413_v20 }
 0x23e   :  { %v1920_v22 = vpop.f32.mrf.mxu1 }
 0x23f   :  { %2122 = vrsqrt.f32 %v414_v21 }
 0x24c   :  { %v2123_v23 = vpop.eup %2122  ;;  %v588_v24 = vpop.f32.mrf.mxu1 }
 0x24d   :  { %v589_v26 = vadd.f32 1e-06, %v588_v24  ;;  %v418_v27 = vmul.f32 %v2123_v23, %v2430_v50  ;;  %v517_v50 = vld [vmem:[%s2753_s19] sm:$0xff] }
 0x24e   :  { %v1974_v28 = vpop.f32.mrf.mxu1 }
 0x24f   :  { %2124 = vrsqrt.f32 %v589_v26  ;;  %v425_v29 = vmul.f32 %v1706_v25, %v418_v27 }
 0x251   :  { %1954 = vmatmul.mubr.f32.vlgmr.msra.gmra.mxu0 %v425_v29  ;;  %v496_v45 = vmul.f32 %v425_v29, %v344_v42 }
 0x252   :  { %1976 = vmatpush3.msra.mxu0 %v514_v30  ;;  %1991 = vmatprep.mubr.msk.f32.mxu0 %vm2149_vm1, %v2148_v7 }
 0x253   :  { %1977 = vmatprep.subr.mxu0 %v2148_v7 }
 0x254   :  { %1978 = vmatpush3.msra.mxu0 %v513_v31 }
 0x255   :  { %1979 = vmatprep.subr.mxu0 %v2148_v7 }
 0x256   :  { %1980 = vmatpush3.msra.mxu0 %v512_v32 }
 0x257   :  { %1981 = vmatprep.subr.mxu0 %v2148_v7 }
 0x258   :  { %1982 = vmatpush3.msra.mxu0 %v511_v33 }
 0x259   :  { %1983 = vmatprep.subr.mxu0 %v2148_v7 }
 0x25a   :  { %1984 = vmatpush3.msra.mxu0 %v510_v34 }
 0x25b   :  { %1985 = vmatprep.subr.mxu0 %v2148_v7 }
 0x25c   :  { %v2125_v37 = vpop.eup %2124  ;;  %1986 = vmatpush3.msra.mxu0 %v509_v35 }
 0x25d   :  { %1987 = vmatprep.subr.mxu0 %v2148_v7  ;;  %v593_v40 = vmul.f32 %v2125_v37, %v2432_v51 }
 0x25e   :  { %1988 = vmatpush3.msra.mxu0 %v508_v36 }
 0x25f   :  { %1989 = vmatprep.subr.mxu0 %v2148_v7  ;;  %v600_v41 = vmul.f32 %v1708_v38, %v593_v40 }
 0x260   :  { %1990 = vmatpush3.msra.mxu0 %v507_v39 }
 0x261   :  { %1992 = vmatmul.mubr.msk.f32.vlgmr.msra.gmra.mxu0 %vm75_vm0, %v600_v41  ;;  %1994 = vmatprep.subr.mxu0 %v2148_v7  ;;  %v674_v52 = vmul.f32 %v600_v41, %v516_v49 }
 0x262   :  { %1996 = vmatprep.mubr.msk.f32.mxu0 %vm2149_vm1, %v2148_v7 }
 0x311   :  { %v492_v44 = vpop.f32.mrf.mxu0 }
 0x312   :  { %v497_v46 = vmul.f32 %v492_v44, %v345_v43 }
 0x313   :  { %v1955_v47 = vpop.f32.mrf.mxu0 }
 0x314   :  { %v498_v48 = vadd.f32 %v497_v46, %v496_v45 }
 0x316   :  { %846 = vrot.lane.b32.xlu1 %v498_v48, %s2150_s14 }
 0x31a   :  { %1006 = vrot.lane.b32.xlu1 %v498_v48, %s2151_s25 }
 0x321   :  { %v670_v51 = vpop.f32.mrf.mxu0 }
 0x322   :  { %v675_v53 = vmul.f32 %v670_v51, %v517_v50 }
 0x323   :  { %v1993_v54 = vpop.f32.mrf.mxu0 }
 0x324   :  { %v676_v55 = vadd.f32 %v675_v53, %v674_v52 }
 0x326   :  { %1995 = vmatpush3.xpose.msk.msra.mxu0 %vm682_vm2, %v676_v55  ;;  %2005 = vmatpush3.xpose.msk.msra.mxu1 %vm682_vm2, %v676_v55 }
 0x327   :  { %1999 = vmatprep.subr.mxu0 %v2148_v7  ;;  %2009 = vmatprep.subr.mxu1 %v2148_v7 }
 0x329   :  { %1997 = vmatmul.mubr.msk.f32.vlgmr.msra.gmra.mxu0 %vm682_vm2, %v498_v48 }
 0x32a   :  { %2000 = vmatpush3.msra.mxu0 %v2468_v3  ;;  %2001 = vmatprep.mubr.msk.f32.mxu0 %vm2149_vm1, %v2148_v7 }
 0x32b   :  { %2014 = vmatprep.subr.mxu0 %v2148_v7 }
 0x388   :  { %v847_v56 = vpop.permute.xlu1 %846 }
 0x389   :  { %2007 = vmatmul.mubr.msk.f32.vlgmr.msra.gmra.mxu1 %vm682_vm2, %v847_v56 }
 0x38a   :  { %2010 = vmatpush3.msra.mxu1 %v2468_v3  ;;  %2011 = vmatprep.mubr.msk.f32.mxu1 %vm2149_vm1, %v2148_v7 }
 0x38b   :  { %2019 = vmatprep.subr.mxu1 %v2148_v7 }
 0x38c   :  { %v1007_v14 = vpop.permute.xlu1 %1006 }
 0x3e9   :  { %v755_v60 = vpop.f32.mrf.mxu0 }
 0x3ea   :  { %v759_v61 = vmul.f32 0.17677669, %v755_v60  ;;  %v2094_v60 = vld [vmem:[%s2777_s27 + $0x28] sm:$0xff]  }
 0x3eb   :  { %v1998_v62 = vpop.f32.mrf.mxu0 }
 0x3ec   :  { %v760_v63 = vsel %vm681_vm3, %v759_v61, -1e+30  ;;  %v2095_v61 = vld [vmem:[%s2777_s27 + $0x20] sm:$0xff]   ;;  %v2096_v62 = vld [vmem:[%s2777_s27 + $0x18] sm:$0xff]  }
 0x3ed   :  { %v762_v0 = vsel %vm761_vm4, %v760_v63, -inf }
 0x3ee   :  { %763 = vmax.xlane.f32.xlu0 %v762_v0  ;;  %v2098_v0 = vld [vmem:[%s2777_s27 + $0x8] sm:$0xff]  }
 0x404   :  { %1008 = vrot.lane.b32.xlu0 %v676_v55, %s2150_s14 }
 0x449   :  { %v916_v1 = vpop.f32.mrf.mxu1 }
 0x44a   :  { %v920_v11 = vmul.f32 0.17677669, %v916_v1  ;;  %v2099_v1 = vld [vmem:[%s2777_s27] sm:$0xff]  }
 0x44b   :  { %v2008_v2 = vpop.f32.mrf.mxu1 }
 0x44c   :  { %v921_v12 = vsel %vm681_vm3, %v920_v11, -1e+30 }
 0x44d   :  { %v922_v13 = vsel %vm761_vm4, %v921_v12, -inf }
 0x477   :  { %v764_v5 = vpop.xlane.xlu0 %763 }
 0x478   :  { %v765_v6 = vsub.f32 %v760_v63, %v764_v5  ;;  %v2097_v63 = vld [vmem:[%s2777_s27 + $0x10] sm:$0xff]  }
 0x47a   :  { %v766_v8 = vmul.f32 1.442695, %v765_v6 }
 0x47b   :  { %v1009_v18 = vpop.permute.xlu0 %1008 }
 0x47c   :  { %2126 = vpow2.f32 %v766_v8 }
 0x489   :  { %v2127_v9 = vpop.eup %2126 }
 0x48a   :  { %v768_v10 = vsel %vm761_vm4, %v2127_v9, 0.0 }
 0x48b   :  { %769 = vadd.xlane.f32.xlu1 %v768_v10 }
 0x49c   :  { %1174 = vrot.lane.b32.xlu1 %v498_v48, %s2152_s17 }
 0x4c0   :  { %923 = vmax.xlane.f32.xlu1 %v922_v13 }
 0x514   :  { %v770_v15 = vpop.xlane.xlu1 %769 }
 0x515   :  { %2128 = vrcp.f32 %v770_v15 }
 0x518   :  { %v1175_v19 = vpop.permute.xlu1 %1174 }
 0x522   :  { %v2129_v16 = vpop.eup %2128 }
 0x523   :  { %v772_v17 = vmul.f32 %v2129_v16, %v2127_v9 }
 0x525   :  { %2002 = vmatmul.mubr.msk.f32.vlgmr.msra.gmra.mxu0 %vm761_vm4, %v772_v17 }
 0x526   :  { %2015 = vmatpush3.xpose.msk.msra.mxu0 %vm682_vm2, %v1009_v18  ;;  %2016 = vmatprep.mubr.msk.f32.mxu0 %vm2149_vm1, %v2148_v7 }
 0x527   :  { %2024 = vmatprep.subr.mxu0 %v2148_v7 }
 0x529   :  { %2017 = vmatmul.mubr.msk.f32.vlgmr.msra.gmra.mxu0 %vm682_vm2, %v1007_v14 }
 0x52a   :  { %2025 = vmatpush3.xpose.msk.msra.mxu0 %vm682_vm2, %v1009_v18  ;;  %2026 = vmatprep.mubr.msk.f32.mxu0 %vm2149_vm1, %v2148_v7 }
 0x52b   :  { %2034 = vmatprep.subr.bf16.mxu0 %v2148_v7 }
 0x52d   :  { %2027 = vmatmul.mubr.msk.f32.vlgmr.msra.gmra.mxu0 %vm682_vm2, %v1175_v19 }
 0x52e   :  { %2050 = vmatprep.mubr.msk.bf16.mxu0 %vm2149_vm1, %v2148_v7  ;;  %2035 = vmatpush3.bf16.msra.mxu0 %v2092_v58 }
 0x52f   :  { %2036 = vmatprep.subr.bf16.mxu0 %v2148_v7 }
 0x532   :  { %2037 = vmatpush3.bf16.msra.mxu0 %v2093_v59 }
 0x533   :  { %2038 = vmatprep.subr.bf16.mxu0 %v2148_v7 }
 0x536   :  { %2039 = vmatpush3.bf16.msra.mxu0 %v2094_v60 }
 0x537   :  { %2040 = vmatprep.subr.bf16.mxu0 %v2148_v7 }
 0x53a   :  { %2041 = vmatpush3.bf16.msra.mxu0 %v2095_v61 }
 0x53b   :  { %2042 = vmatprep.subr.bf16.mxu0 %v2148_v7 }
 0x53e   :  { %2043 = vmatpush3.bf16.msra.mxu0 %v2096_v62 }
 0x53f   :  { %2044 = vmatprep.subr.bf16.mxu0 %v2148_v7 }
 0x542   :  { %2045 = vmatpush3.bf16.msra.mxu0 %v2097_v63 }
 0x543   :  { %2046 = vmatprep.subr.bf16.mxu0 %v2148_v7 }
 0x546   :  { %2047 = vmatpush3.bf16.msra.mxu0 %v2098_v0 }
 0x547   :  { %2048 = vmatprep.subr.bf16.mxu0 %v2148_v7 }
 0x549   :  { %v924_v20 = vpop.xlane.xlu1 %923 }
 0x54a   :  { %v925_v21 = vsub.f32 %v921_v12, %v924_v20  ;;  %2049 = vmatpush3.bf16.msra.mxu0 %v2099_v1 }
 0x54c   :  { %v926_v22 = vmul.f32 1.442695, %v925_v21 }
 0x54e   :  { %2130 = vpow2.f32 %v926_v22 }
 0x55b   :  { %v2131_v35 = vpop.eup %2130 }
 0x55c   :  { %v928_v36 = vsel %vm761_vm4, %v2131_v35, 0.0 }
 0x5e5   :  { %v2610_v23 = vpop.f32.mrf.mxu0 }
 0x5e7   :  { %v2003_v24 = vpop.f32.mrf.mxu0 }
 0x5e8   :  { %v2100_v24 = vld [vmem:[%s2756_s8 + $0x30] ss:$8 sps:$4 sm:$0xff]  }
 0x5e9   :  { %v1080_v25 = vpop.f32.mrf.mxu0 }
 0x5ea   :  { %v1084_v26 = vmul.f32 0.17677669, %v1080_v25  ;;  %v2153_v25 = vmov 0  }
 0x5eb   :  { %v2018_v27 = vpop.f32.mrf.mxu0 }
 0x5ec   :  { %v1085_v28 = vsel %vm681_vm3, %v1084_v26, -1e+30  ;;  %v2105_v26 = vld [vmem:[%s2756_s8 + $0x24] ss:$8 sps:$4 sm:$0xff]   ;;  %v2103_v27 = vld [vmem:[%s2756_s8 + $0x20] ss:$8 sps:$4 sm:$0xff]  }
 0x5ed   :  { %v1244_v29 = vpop.f32.mrf.mxu0  ;;  %v1086_v30 = vsel %vm761_vm4, %v1085_v28, -inf }
 0x5ee   :  { %v1248_v31 = vmul.f32 0.17677669, %v1244_v29  ;;  %1087 = vmax.xlane.f32.xlu0 %v1086_v30  ;;  %v2106_v29 = vld [vmem:[%s2756_s8 + $0x10] ss:$8 sps:$4 sm:$0xff]   ;;  %v2111_v30 = vld [vmem:[%s2756_s8 + $0x4] ss:$8 sps:$4 sm:$0xff]  }
 0x5ef   :  { %v2028_v32 = vpop.f32.mrf.mxu0 }
 0x5f0   :  { %v1249_v33 = vsel %vm681_vm3, %v1248_v31, -1e+30  ;;  %v2109_v31 = vld [vmem:[%s2756_s8] ss:$8 sps:$4 sm:$0xff]  }
 0x5f1   :  { %v1250_v34 = vsel %vm761_vm4, %v1249_v33, -inf }
 0x5f2   :  { %1251 = vmax.xlane.f32.xlu0 %v1250_v34 }
 0x5f6   :  { %929 = vadd.xlane.f32.xlu0 %v928_v36  ;;  %v1730_v36 = vld [vmem:[%s2757_s3] ss:$0 sm:$0xff] }
 0x677   :  { %v1088_v37 = vpop.xlane.xlu0 %1087 }
 0x678   :  { %v1089_v38 = vsub.f32 %v1085_v28, %v1088_v37  ;;  %v2108_v28 = vld [vmem:[%s2756_s8 + $0x14] ss:$8 sps:$4 sm:$0xff]  }
 0x67a   :  { %v1090_v39 = vmul.f32 1.442695, %v1089_v38 }
 0x67b   :  { %v1252_v40 = vpop.xlane.xlu0 %1251 }
 0x67c   :  { %2132 = vpow2.f32 %v1090_v39  ;;  %v1253_v41 = vsub.f32 %v1249_v33, %v1252_v40  ;;  %v2112_v40 = vld [vmem:[%s2758_s9 + $0x38] sm:$0xff]  }
 0x67e   :  { %v1254_v42 = vmul.f32 1.442695, %v1253_v41  ;;  %v2113_v41 = vld [vmem:[%s2758_s9 + $0x30] sm:$0xff]  }
 0x67f   :  { %v930_v43 = vpop.xlane.xlu0 %929 }
 0x680   :  { %2134 = vpow2.f32 %v1254_v42  ;;  %v2114_v42 = vld [vmem:[%s2758_s9 + $0x28] sm:$0xff]  }
 0x681   :  { %2136 = vrcp.f32 %v930_v43  ;;  %v2115_v43 = vld [vmem:[%s2758_s9 + $0x20] sm:$0xff]  }
 0x689   :  { %v2133_v44 = vpop.eup %2132 }
 0x68a   :  { %v1092_v45 = vsel %vm761_vm4, %v2133_v44, 0.0 }
 0x68b   :  { %1093 = vadd.xlane.f32.xlu1 %v1092_v45  ;;  %v2117_v45 = vld [vmem:[%s2758_s9 + $0x10] sm:$0xff]  }
 0x68d   :  { %v2135_v46 = vpop.eup %2134 }
 0x68e   :  { %v2137_v47 = vpop.eup %2136  ;;  %v1256_v48 = vsel %vm761_vm4, %v2135_v46, 0.0 }
 0x68f   :  { %1257 = vadd.xlane.f32.xlu0 %v1256_v48  ;;  %v932_v49 = vmul.f32 %v2137_v47, %v2131_v35  ;;  %v2119_v47 = vld [vmem:[%s2758_s9] sm:$0xff]  }
 0x691   :  { %2012 = vmatmul.mubr.msk.f32.vlgmr.msra.gmra.mxu1 %vm761_vm4, %v932_v49 }
 0x692   :  { %2021 = vmatprep.mubr.msk.f32.mxu1 %vm2149_vm1, %v2148_v7 }
 0x69c   :  { %1098 = vrot.lane.b32.xlu1 %v2468_v3, %s2150_s14 }
 0x714   :  { %v1094_v50 = vpop.xlane.xlu1 %1093 }
 0x715   :  { %2138 = vrcp.f32 %v1094_v50 }
 0x718   :  { %v1099_v51 = vpop.permute.xlu1 %1098  ;;  %v1258_v52 = vpop.xlane.xlu0 %1257 }
 0x719   :  { %2140 = vrcp.f32 %v1258_v52  ;;  %2020 = vmatpush3.msra.mxu1 %v1099_v51 }
 0x71a   :  { %2029 = vmatprep.subr.mxu1 %v2148_v7 }
 0x722   :  { %v2139_v53 = vpop.eup %2138 }
 0x723   :  { %v1096_v54 = vmul.f32 %v2139_v53, %v2133_v44  ;;  %v2116_v44 = vld [vmem:[%s2758_s9 + $0x18] sm:$0xff]  }
 0x725   :  { %2022 = vmatmul.mubr.msk.f32.vlgmr.msra.gmra.mxu1 %vm761_vm4, %v1096_v54 }
 0x726   :  { %v2141_v55 = vpop.eup %2140  ;;  %2030 = vmatpush3.msra.mxu1 %v1099_v51  ;;  %2031 = vmatprep.mubr.msk.f32.mxu1 %vm2149_vm1, %v2148_v7 }
 0x727   :  { %v1260_v56 = vmul.f32 %v2141_v55, %v2135_v46  ;;  %v2118_v46 = vld [vmem:[%s2758_s9 + $0x8] sm:$0xff]  }
 0x729   :  { %2032 = vmatmul.mubr.msk.f32.vlgmr.msra.gmra.mxu1 %vm761_vm4, %v1260_v56 }
 0x72a   :  { %1558 = vmatprep.mubr.bf16.mxu1 %v2153_v25 }
 0x751   :  { %v1002_v3 = vpop.f32.mrf.mxu1 }
 0x752   :  { %1335 = vrot.lane.b32.xlu0 %v1002_v3, %s2152_s17 }
 0x753   :  { %v2013_v57 = vpop.f32.mrf.mxu1 }
 0x7c4   :  { %v1336_v9 = vpop.permute.xlu0 %1335 }
 0x7c5   :  { %v1346_v11 = vsel %vm682_vm2, %v2610_v23, %v1336_v9 }
 0x7e5   :  { %v1170_v2 = vpop.f32.mrf.mxu1 }
 0x7e6   :  { %1339 = vrot.lane.b32.xlu1 %v1170_v2, %s2151_s25 }
 0x7e7   :  { %v2023_v5 = vpop.f32.mrf.mxu1 }
 0x7e9   :  { %v1330_v6 = vpop.f32.mrf.mxu1 }
 0x7ea   :  { %1343 = vrot.lane.b32.xlu1 %v1330_v6, %s2150_s14 }
 0x7eb   :  { %v2033_v8 = vpop.f32.mrf.mxu1 }
 0x858   :  { %v1340_v10 = vpop.permute.xlu1 %1339 }
 0x859   :  { %v1347_v12 = vsel %vm75_vm0, %v1346_v11, %v1340_v10 }
 0x85c   :  { %v1344_v13 = vpop.permute.xlu1 %1343 }
 0x85d   :  { %v1349_v14 = vsel %vm1348_vm5, %v1347_v12, %v1344_v13 }
 0x85e   :  { %v1350_v15 = vpack.c.bf16 %v1349_v14, %v1349_v14 }
 0x860   :  { %2051 = vmatmul.mubr.bf16.vlgmr.msra.gmra.mxu0 %v1350_v15 }
 0x920   :  { %v1449_v16 = vpop.f32.mrf.mxu0 }
 0x921   :  { %v1450_v17 = vadd.f32 %v1449_v16, %v2270_v4  ;;  %v2102_v4 = vld [vmem:[%s2756_s8 + $0x34] ss:$8 sps:$4 sm:$0xff]  }
 0x922   :  { %v2052_v18 = vpop.f32.mrf.mxu0  ;;  %1534 = vmatprep.subr.bf16.mxu1 %v2102_v4 }
 0x923   :  { %v1455_v19 = vpack.c.bf16 %v1450_v17, %v1450_v17  ;;  %v1459_v20 = vmul.f32 %v1450_v17, %v1450_v17  ;;  %1535 = vmatpush1.bf16.msra.mxu1 %v2100_v24 }
 0x924   :  { %v1452_v21 = vpop.f32.mrf.mxu0  ;;  %1536 = vmatprep.subr.bf16.mxu1 %v2105_v26 }
 0x925   :  { %v1460_v22 = vsel %vm75_vm0, %v1459_v20, 0.0  ;;  %1457 = vst.msk [vmem:[%s2755_s21] sm:$0xf] %vm1456_vm6, %v1455_v19 }
 0x926   :  { %1461 = vadd.xlane.f32.xlu1 %v1460_v22  ;;  %v2053_v23 = vpop.f32.mrf.mxu0 }
 0x927   :  { %1537 = vmatpush1.bf16.msra.mxu1 %v2103_v27 }
 0x928   :  { %1538 = vmatprep.subr.bf16.mxu1 %v2108_v28 }
 0x92b   :  { %1539 = vmatpush1.bf16.msra.mxu1 %v2106_v29 }
 0x92c   :  { %1540 = vmatprep.subr.bf16.mxu1 %v2111_v30 }
 0x92f   :  { %1541 = vmatpush1.bf16.msra.mxu1 %v2109_v31 }
 0x930   :  { %2054 = vmatprep.subr.bf16.mxu1 %v2148_v7 }
 0x9af   :  { %v1462_v32 = vpop.xlane.xlu1 %1461 }
 0x9b0   :  { %v1463_v33 = vmul.f32 0.015625, %v1462_v32 }
 0x9b2   :  { %v1464_v34 = vadd.f32 1e-06, %v1463_v33 }
 0x9b4   :  { %2142 = vrsqrt.f32 %v1464_v34 }
 0x9c1   :  { %v2143_v35 = vpop.eup %2142 }
 0x9c2   :  { %v1466_v37 = vmul.f32 %v2143_v35, %v1450_v17 }
 0x9c4   :  { %v1473_v38 = vmul.f32 %v1730_v36, %v1466_v37 }
 0x9c6   :  { %v1474_v39 = vpack.c.bf16 %v1473_v38, %v1473_v38 }
 0x9c8   :  { %1739 = vmatmul.mubr.msk.bf16.vlgmr.msra.gmra.mxu1 %vm75_vm0, %v1474_v39 }
 0x9c9   :  { %2070 = vmatprep.mubr.msk.bf16.mxu1 %vm2149_vm1, %v2148_v7  ;;  %2055 = vmatpush3.bf16.msra.mxu1 %v2112_v40 }
 0x9ca   :  { %2056 = vmatprep.subr.bf16.mxu1 %v2148_v7 }
 0x9cd   :  { %2057 = vmatpush3.bf16.msra.mxu1 %v2113_v41 }
 0x9ce   :  { %2058 = vmatprep.subr.bf16.mxu1 %v2148_v7 }
 0x9d1   :  { %2059 = vmatpush3.bf16.msra.mxu1 %v2114_v42 }
 0x9d2   :  { %2060 = vmatprep.subr.bf16.mxu1 %v2148_v7 }
 0x9d5   :  { %2061 = vmatpush3.bf16.msra.mxu1 %v2115_v43 }
 0x9d6   :  { %2062 = vmatprep.subr.bf16.mxu1 %v2148_v7 }
 0x9d9   :  { %2063 = vmatpush3.bf16.msra.mxu1 %v2116_v44 }
 0x9da   :  { %2064 = vmatprep.subr.bf16.mxu1 %v2148_v7 }
 0x9dd   :  { %2065 = vmatpush3.bf16.msra.mxu1 %v2117_v45 }
 0x9de   :  { %2066 = vmatprep.subr.bf16.mxu1 %v2148_v7 }
 0x9e1   :  { %2067 = vmatpush3.bf16.msra.mxu1 %v2118_v46 }
 0x9e2   :  { %2068 = vmatprep.subr.bf16.mxu1 %v2148_v7 }
 0x9e5   :  { %2069 = vmatpush3.bf16.msra.mxu1 %v2119_v47 }
 0xa88   :  { %v1560_v48 = vpop.f32.mrf.mxu1 }
 0xa89   :  { %v1740_v49 = vmul.f32 -1.442695, %v1560_v48 }
 0xa8a   :  { %v1562_v50 = vpop.f32.mrf.mxu1 }
 0xa8b   :  { %2144 = vpow2.f32 %v1740_v49 }
 0xa8c   :  { %v1564_v51 = vpop.f32.mrf.mxu1 }
 0xa8e   :  { %v1565_v52 = vpop.f32.mrf.mxu1 }
 0xa98   :  { %v2145_v53 = vpop.eup %2144 }
 0xa99   :  { %v1570_v54 = vadd.f32 1.0, %v2145_v53 }
 0xa9b   :  { %2146 = vrcp.f32 %v1570_v54 }
 0xaa8   :  { %v2147_v55 = vpop.eup %2146 }
 0xaa9   :  { %v1573_v56 = vmul.f32 %v2147_v55, %v1560_v48 }
 0xaab   :  { %v1574_v3 = vmul.f32 %v1573_v56, %v1562_v50 }
 0xaad   :  { %v1575_v57 = vpack.c.bf16 %v1574_v3, %v1574_v3 }
 0xaaf   :  { %2071 = vmatmul.mubr.bf16.vlgmr.msra.gmra.mxu1 %v1575_v57 }
 0xb6f   :  { %v1674_v7 = vpop.f32.mrf.mxu1 }
 0xb70   :  { %v1680_v58 = vpack.c.bf16 %v1674_v7, %v1674_v7 }
 0xb71   :  { %v2072_v59 = vpop.f32.mrf.mxu1 }
 0xb72   :  { %1681 = vst.msk [vmem:[%s2759_s20] sm:$0xf] %vm1456_vm6, %v1680_v58 }
 0xb73   :  { %v1677_v60 = vpop.f32.mrf.mxu1 }
 0xb75   :  { %v2073_v61 = vpop.f32.mrf.mxu1 }

</bundles_post_ra>
